<compile_context>
chip_gen: v7x
topology: tpu7x:2x2x1
jax: 0.10.0
libtpu: 0.0.40
codegen_flags: <defaults>
</compile_context>

<pallas_src>
import functools
import math

import jax
import jax.numpy as jnp
from jax import lax
from jax.experimental import pallas as pl
from jax.experimental.pallas import tpu as pltpu

EPS = 1e-5


# ----------------------------------------------------------------------------- kernel
def _conv_bn_relu_kernel(taps_ref, w_ref, g_ref, b_ref, o_ref):
    """out(Cout, M) = ReLU(BN_train( W(Cout,9Cin) @ taps(9Cin,M) ))."""
    # Single MXU matmul, contraction dim = 9*Cin.
    acc = jnp.dot(w_ref[...], taps_ref[...], preferred_element_type=jnp.float32)

    # Training-mode BatchNorm statistics over the batch*spatial (lane) axis.
    inv_m = 1.0 / acc.shape[1]
    mean = jnp.sum(acc, axis=1, keepdims=True) * inv_m            # (Cout, 1)
    mean_sq = jnp.sum(acc * acc, axis=1, keepdims=True) * inv_m   # (Cout, 1)
    var = mean_sq - mean * mean                                   # biased variance

    # Fused affine:  y = acc*scale + shift,  then ReLU.
    scale = g_ref[...] * lax.rsqrt(var + EPS)                     # (Cout, 1)
    shift = b_ref[...] - mean * scale                             # (Cout, 1)
    o_ref[...] = jnp.maximum(acc * scale + shift, 0.0)


def fused_conv_bn_relu(taps, w2, gamma, beta):
    K9, M = taps.shape
    Cout = w2.shape[0]
    return pl.pallas_call(
        _conv_bn_relu_kernel,
        out_shape=jax.ShapeDtypeStruct((Cout, M), jnp.float32),
        grid=(1,),
        in_specs=[
            pl.BlockSpec((K9, M), lambda i: (0, 0)),
            pl.BlockSpec((Cout, K9), lambda i: (0, 0)),
            pl.BlockSpec((Cout, 1), lambda i: (0, 0)),
            pl.BlockSpec((Cout, 1), lambda i: (0, 0)),
        ],
        out_specs=pl.BlockSpec((Cout, M), lambda i: (0, 0)),
        compiler_params=pltpu.CompilerParams(
            dimension_semantics=("arbitrary",),
            vmem_limit_bytes=32 * 1024 * 1024,
        ),
    )(taps, w2, gamma, beta)


# --------------------------------------------------------------------- glue (reshapes)
def _im2col_cnhw(xp, Ho, Wo, stride):
    """xp: padded CNHW input (C, N, Hp, Wp).  Returns (9*C, N*Ho*Wo)."""
    C, N = xp.shape[0], xp.shape[1]
    cols = []
    for dy in range(3):
        for dx in range(3):
            sl = lax.slice(
                xp,
                (0, 0, dy, dx),
                (C, N, dy + stride * (Ho - 1) + 1, dx + stride * (Wo - 1) + 1),
                (1, 1, stride, stride),
            )
            cols.append(sl.reshape(C, N * Ho * Wo))
    return jnp.concatenate(cols, axis=0)


def conv_bn_relu_layer(x_cnhw, w_oihw, gamma, beta, stride):
    """nn.Conv2d(3x3, stride, padding=1, bias=False) + BatchNorm2d + ReLU (CNHW layout)."""
    C, N, H, W = x_cnhw.shape
    Cout = w_oihw.shape[0]
    xp = jnp.pad(x_cnhw, ((0, 0), (0, 0), (1, 1), (1, 1)))
    Ho = (H + 2 - 3) // stride + 1
    Wo = (W + 2 - 3) // stride + 1
    taps = _im2col_cnhw(xp, Ho, Wo, stride)
    w2 = jnp.transpose(w_oihw, (0, 2, 3, 1)).reshape(Cout, 9 * C)
    out = fused_conv_bn_relu(taps, w2, gamma.reshape(Cout, 1), beta.reshape(Cout, 1))
    return out.reshape(Cout, N, Ho, Wo)


def conv_transpose_bn_relu_layer(x_cnhw, w_iohw, gamma, beta, stride):
    """nn.ConvTranspose2d(3x3, stride, padding=1, output_padding=stride-1) + BN + ReLU.

    ConvTranspose == zero-dilate the input by `stride`, pad (1, stride) per spatial side,
    then a stride-1 cross-correlation with the spatially-flipped, in/out-swapped kernel.
    The per-channel bias cancels exactly against the training-mode BatchNorm batch mean,
    so it is not applied.
    """
    C, N, H, W = x_cnhw.shape
    Cout = w_iohw.shape[1]
    if stride > 1:
        xd = jnp.zeros((C, N, (H - 1) * stride + 1, (W - 1) * stride + 1), x_cnhw.dtype)
        xd = xd.at[:, :, ::stride, ::stride].set(x_cnhw)
    else:
        xd = x_cnhw
    xp = jnp.pad(xd, ((0, 0), (0, 0), (1, stride), (1, stride)))
    Ho, Wo = H * stride, W * stride
    taps = _im2col_cnhw(xp, Ho, Wo, 1)
    w_eq = jnp.transpose(jnp.flip(w_iohw, axis=(2, 3)), (1, 0, 2, 3))  # -> OIHW
    w2 = jnp.transpose(w_eq, (0, 2, 3, 1)).reshape(Cout, 9 * C)
    out = fused_conv_bn_relu(taps, w2, gamma.reshape(Cout, 1), beta.reshape(Cout, 1))
    return out.reshape(Cout, N, Ho, Wo)


# ----------------------------------------------------------------- params & forwards
def make_arch(backbone_stride):
    """Static (hashable) architecture description: per-layer strides."""
    block_strides = (
        (backbone_stride, 1, 1, 1),       # Block(1,  s0, 4)
        (2, 1, 1, 1, 1, 1),               # Block(s0, s1, 6)
        (2, 1, 1, 1, 1, 1),               # Block(s1, s2, 6)
    )
    up_strides = (1, 2, 4)                # Up(s0,s0), Up(s1,s0), Up(s2,s0)
    return (block_strides, up_strides)


def init_backbone_params(key, encoder_channels):
    f = [encoder_channels, 2 * encoder_channels, 4 * encoder_channels]
    depths = [4, 6, 6]
    in_ch = [encoder_channels, f[0], f[1]]

    def init_conv(key, cin, cout):
        key, kw, kg, kb = jax.random.split(key, 4)
        w = jax.random.normal(kw, (cout, cin, 3, 3), jnp.float32) / math.sqrt(9 * cin)
        gamma = 1.0 + 0.1 * jax.random.normal(kg, (cout,), jnp.float32)
        beta = 0.1 * jax.random.normal(kb, (cout,), jnp.float32)
        return key, dict(w=w, gamma=gamma, beta=beta)

    params = {}
    for bi, (depth, cin, cout) in enumerate(zip(depths, in_ch, f), start=1):
        layers = []
        c = cin
        for _ in range(depth):
            key, lyr = init_conv(key, c, cout)
            layers.append(lyr)
            c = cout
        params[f"block{bi}"] = layers

    for ui, cin in enumerate([f[0], f[1], f[2]], start=1):
        cout = f[1]
        key, kw, kbias, kg, kb = jax.random.split(key, 5)
        w = jax.random.normal(kw, (cin, cout, 3, 3), jnp.float32) / math.sqrt(9 * cin)
        bias = 0.1 * jax.random.normal(kbias, (cout,), jnp.float32)
        gamma = 1.0 + 0.1 * jax.random.normal(kg, (cout,), jnp.float32)
        beta = 0.1 * jax.random.normal(kb, (cout,), jnp.float32)
        params[f"up{ui}"] = dict(w=w, bias=bias, gamma=gamma, beta=beta)
    return params


@functools.partial(jax.jit, static_argnums=(2,))
def backbone_forward_pallas(x_nchw, params, arch):
    block_strides, up_strides = arch
    h = jnp.transpose(x_nchw, (1, 0, 2, 3))  # NCHW -> CNHW (kept for the whole pipeline)

    def run_block(h, layers, strides):
        for lyr, s in zip(layers, strides):
            h = conv_bn_relu_layer(h, lyr["w"], lyr["gamma"], lyr["beta"], s)
        return h

    x1 = run_block(h, params["block1"], block_strides[0])
    x2 = run_block(x1, params["block2"], block_strides[1])
    x3 = run_block(x2, params["block3"], block_strides[2])

    u1 = conv_transpose_bn_relu_layer(x1, params["up1"]["w"], params["up1"]["gamma"],
                                      params["up1"]["beta"], up_strides[0])
    u2 = conv_transpose_bn_relu_layer(x2, params["up2"]["w"], params["up2"]["gamma"],
                                      params["up2"]["beta"], up_strides[1])
    u3 = conv_transpose_bn_relu_layer(x3, params["up3"]["w"], params["up3"]["gamma"],
                                      params["up3"]["beta"], up_strides[2])

    out = jnp.concatenate([u1, u2, u3], axis=0)   # channel cat in CNHW
    return jnp.transpose(out, (1, 0, 2, 3))       # CNHW -> NCHW


# -------------------------------------------------------------- pure-JAX reference
def _ref_bn_relu(y, gamma, beta):
    mean = jnp.mean(y, axis=(0, 2, 3), keepdims=True)
    var = jnp.mean((y - mean) ** 2, axis=(0, 2, 3), keepdims=True)
    yn = (y - mean) * lax.rsqrt(var + EPS)
    return jnp.maximum(yn * gamma.reshape(1, -1, 1, 1) + beta.reshape(1, -1, 1, 1), 0.0)


def backbone_forward_reference(x, params, arch):
    block_strides, up_strides = arch
    dn = ("NCHW", "OIHW", "NCHW")

    def conv(h, lyr, stride):
        y = lax.conv_general_dilated(h, lyr["w"], (stride, stride), ((1, 1), (1, 1)),
                                     dimension_numbers=dn, precision=lax.Precision.HIGHEST)
        return _ref_bn_relu(y, lyr["gamma"], lyr["beta"])

    def convt(h, up, s):
        w_eq = jnp.transpose(jnp.flip(up["w"], axis=(2, 3)), (1, 0, 2, 3))
        y = lax.conv_general_dilated(h, w_eq, (1, 1), ((1, s), (1, s)),
                                     lhs_dilation=(s, s), dimension_numbers=dn,
                                     precision=lax.Precision.HIGHEST)
        y = y + up["bias"].reshape(1, -1, 1, 1)   # reference applies the bias explicitly
        return _ref_bn_relu(y, up["gamma"], up["beta"])

    h = x
    for lyr, s in zip(params["block1"], block_strides[0]):
        h = conv(h, lyr, s)
    x1 = h
    for lyr, s in zip(params["block2"], block_strides[1]):
        h = conv(h, lyr, s)
    x2 = h
    for lyr, s in zip(params["block3"], block_strides[2]):
        h = conv(h, lyr, s)
    x3 = h
    u1 = convt(x1, params["up1"], up_strides[0])
    u2 = convt(x2, params["up2"], up_strides[1])
    u3 = convt(x3, params["up3"], up_strides[2])
    return jnp.concatenate([u1, u2, u3], axis=1)


# ------------------------------------------------------------------------------ main
if __name__ == "__main__":
    encoder_channels = 8   # config.encoder_channels
    backbone_stride = 2    # config.backbone_stride

    key = jax.random.PRNGKey(0)
    key, xkey = jax.random.split(key)
    # Input is NCHW with C == encoder_channels (block1's first conv expects that).
    x = jax.random.normal(xkey, (2, encoder_channels, 16, 16), jnp.float32)

    params = init_backbone_params(key, encoder_channels)
    arch = make_arch(backbone_stride)

    out = backbone_forward_pallas(x, params, arch)
    out = jax.block_until_ready(out)

    ref = backbone_forward_reference(x, params, arch)
    ref = jax.block_until_ready(ref)

    expected_shape = (2, 6 * encoder_channels, 16 // backbone_stride, 16 // backbone_stride)
    assert out.shape == expected_shape, (out.shape, expected_shape)
    err = float(jnp.max(jnp.abs(out - ref)))
    assert err < 5e-2, f"mismatch vs reference: max abs err = {err}"

    print("KERNEL_OK")
</pallas_src>

<mosaic_0001>
module attributes {stable_mosaic.version = 11 : i64} {
  func.func @_conv_bn_relu_kernel(%arg0: i32, %arg1: memref<72x128xf32, #tpu.memory_space<vmem>>, %arg2: memref<8x72xf32, #tpu.memory_space<vmem>>, %arg3: memref<8x1xf32, #tpu.memory_space<vmem>>, %arg4: memref<8x1xf32, #tpu.memory_space<vmem>>, %arg5: memref<8x128xf32, #tpu.memory_space<vmem>>) attributes {dimension_semantics = [#tpu.dimension_semantics<arbitrary>], iteration_bounds = array<i64: 1>, scalar_prefetch = 0 : i64, scratch_operands = 0 : i64, tpu.core_type = #tpu.core_type<tc>, window_params = [{pipeline_mode = #tpu.pipeline_mode<synchronous>, transform_indices = @transform_0, window_bounds = array<i64: 72, 128>}, {pipeline_mode = #tpu.pipeline_mode<synchronous>, transform_indices = @transform_1, window_bounds = array<i64: 8, 72>}, {pipeline_mode = #tpu.pipeline_mode<synchronous>, transform_indices = @transform_2, window_bounds = array<i64: 8, 1>}, {pipeline_mode = #tpu.pipeline_mode<synchronous>, transform_indices = @transform_3, window_bounds = array<i64: 8, 1>}, {pipeline_mode = #tpu.pipeline_mode<synchronous>, transform_indices = @transform_4, window_bounds = array<i64: 8, 128>}]} {
    %c0 = arith.constant 0 : index
    %c0_0 = arith.constant 0 : index
    %0 = vector.load %arg2[%c0, %c0_0] : memref<8x72xf32, #tpu.memory_space<vmem>>, vector<8x72xf32>
    %c0_1 = arith.constant 0 : index
    %c0_2 = arith.constant 0 : index
    %1 = vector.load %arg1[%c0_1, %c0_2] : memref<72x128xf32, #tpu.memory_space<vmem>>, vector<72x128xf32>
    %cst = arith.constant dense<0.000000e+00> : vector<8x128xf32>
    %2 = tpu.matmul %0, %1, %cst {dimension_numbers = #tpu.dot_dimension_numbers<[1], [0], [0], [1], [0, 0, 1, 1], [], []>} : vector<8x72xf32>, vector<72x128xf32>, vector<8x128xf32> -> vector<8x128xf32>
    %cst_3 = arith.constant dense<0.000000e+00> : vector<8xf32>
    %3 = vector.multi_reduction <add>, %2, %cst_3 [1] : vector<8x128xf32> to vector<8xf32>
    %4 = vector.shape_cast %3 : vector<8xf32> to vector<8x1xf32>
    %cst_4 = arith.constant 7.812500e-03 : f32
    %5 = vector.broadcast %cst_4 : f32 to vector<8x1xf32>
    %6 = arith.mulf %4, %5 : vector<8x1xf32>
    %7 = arith.mulf %2, %2 : vector<8x128xf32>
    %cst_5 = arith.constant dense<0.000000e+00> : vector<8xf32>
    %8 = vector.multi_reduction <add>, %7, %cst_5 [1] : vector<8x128xf32> to vector<8xf32>
    %9 = vector.shape_cast %8 : vector<8xf32> to vector<8x1xf32>
    %cst_6 = arith.constant 7.812500e-03 : f32
    %10 = vector.broadcast %cst_6 : f32 to vector<8x1xf32>
    %11 = arith.mulf %9, %10 : vector<8x1xf32>
    %12 = arith.mulf %6, %6 : vector<8x1xf32>
    %13 = arith.subf %11, %12 : vector<8x1xf32>
    %c0_7 = arith.constant 0 : index
    %c0_8 = arith.constant 0 : index
    %14 = vector.load %arg3[%c0_7, %c0_8] : memref<8x1xf32, #tpu.memory_space<vmem>>, vector<8x1xf32>
    %cst_9 = arith.constant 9.99999974E-6 : f32
    %15 = vector.broadcast %cst_9 : f32 to vector<8x1xf32>
    %16 = arith.addf %13, %15 : vector<8x1xf32>
    %17 = math.rsqrt %16 : vector<8x1xf32>
    %18 = arith.mulf %14, %17 : vector<8x1xf32>
    %c0_10 = arith.constant 0 : index
    %c0_11 = arith.constant 0 : index
    %19 = vector.load %arg4[%c0_10, %c0_11] : memref<8x1xf32, #tpu.memory_space<vmem>>, vector<8x1xf32>
    %20 = arith.mulf %6, %18 : vector<8x1xf32>
    %21 = arith.subf %19, %20 : vector<8x1xf32>
    %22 = vector.broadcast %18 : vector<8x1xf32> to vector<8x128xf32>
    %23 = arith.mulf %2, %22 : vector<8x128xf32>
    %24 = vector.broadcast %21 : vector<8x1xf32> to vector<8x128xf32>
    %25 = arith.addf %23, %24 : vector<8x128xf32>
    %cst_12 = arith.constant 0.000000e+00 : f32
    %26 = vector.broadcast %cst_12 : f32 to vector<8x128xf32>
    %27 = arith.maximumf %25, %26 : vector<8x128xf32>
    %c0_13 = arith.constant 0 : index
    %c0_14 = arith.constant 0 : index
    %28 = vector.load %arg5[%c0_13, %c0_14] : memref<8x128xf32, #tpu.memory_space<vmem>>, vector<8x128xf32>
    tpu.vector_store %arg5[%c0_13, %c0_14], %27 {strides = array<i32>} : memref<8x128xf32, #tpu.memory_space<vmem>>, vector<8x128xf32>,
    return
  }
  func.func @transform_0(%arg0: i32) -> (i32, i32) {
    %c0_i32 = arith.constant 0 : i32
    %c0_i32_0 = arith.constant 0 : i32
    %c0_i32_1 = arith.constant 0 : i32
    return %c0_i32, %c0_i32_0 : i32, i32
  }
  func.func @transform_1(%arg0: i32) -> (i32, i32) {
    %c0_i32 = arith.constant 0 : i32
    %c0_i32_0 = arith.constant 0 : i32
    %c0_i32_1 = arith.constant 0 : i32
    return %c0_i32, %c0_i32_0 : i32, i32
  }
  func.func @transform_2(%arg0: i32) -> (i32, i32) {
    %c0_i32 = arith.constant 0 : i32
    %c0_i32_0 = arith.constant 0 : i32
    %c0_i32_1 = arith.constant 0 : i32
    return %c0_i32, %c0_i32_0 : i32, i32
  }
  func.func @transform_3(%arg0: i32) -> (i32, i32) {
    %c0_i32 = arith.constant 0 : i32
    %c0_i32_0 = arith.constant 0 : i32
    %c0_i32_1 = arith.constant 0 : i32
    return %c0_i32, %c0_i32_0 : i32, i32
  }
  func.func @transform_4(%arg0: i32) -> (i32, i32) {
    %c0_i32 = arith.constant 0 : i32
    %c0_i32_0 = arith.constant 0 : i32
    %c0_i32_1 = arith.constant 0 : i32
    return %c0_i32, %c0_i32_0 : i32, i32
  }
}

module attributes {stable_mosaic.version = 11 : i64} {
  func.func @_conv_bn_relu_kernel(%arg0: i32, %arg1: memref<72x32xf32, #tpu.memory_space<vmem>>, %arg2: memref<16x72xf32, #tpu.memory_space<vmem>>, %arg3: memref<16x1xf32, #tpu.memory_space<vmem>>, %arg4: memref<16x1xf32, #tpu.memory_space<vmem>>, %arg5: memref<16x32xf32, #tpu.memory_space<vmem>>) attributes {dimension_semantics = [#tpu.dimension_semantics<arbitrary>], iteration_bounds = array<i64: 1>, scalar_prefetch = 0 : i64, scratch_operands = 0 : i64, tpu.core_type = #tpu.core_type<tc>, window_params = [{pipeline_mode = #tpu.pipeline_mode<synchronous>, transform_indices = @transform_0, window_bounds = array<i64: 72, 32>}, {pipeline_mode = #tpu.pipeline_mode<synchronous>, transform_indices = @transform_1, window_bounds = array<i64: 16, 72>}, {pipeline_mode = #tpu.pipeline_mode<synchronous>, transform_indices = @transform_2, window_bounds = array<i64: 16, 1>}, {pipeline_mode = #tpu.pipeline_mode<synchronous>, transform_indices = @transform_3, window_bounds = array<i64: 16, 1>}, {pipeline_mode = #tpu.pipeline_mode<synchronous>, transform_indices = @transform_4, window_bounds = array<i64: 16, 32>}]} {
    %c0 = arith.constant 0 : index
    %c0_0 = arith.constant 0 : index
    %0 = vector.load %arg2[%c0, %c0_0] : memref<16x72xf32, #tpu.memory_space<vmem>>, vector<16x72xf32>
    %c0_1 = arith.constant 0 : index
    %c0_2 = arith.constant 0 : index
    %1 = vector.load %arg1[%c0_1, %c0_2] : memref<72x32xf32, #tpu.memory_space<vmem>>, vector<72x32xf32>
    %cst = arith.constant dense<0.000000e+00> : vector<16x32xf32>
    %2 = tpu.matmul %0, %1, %cst {dimension_numbers = #tpu.dot_dimension_numbers<[1], [0], [0], [1], [0, 0, 1, 1], [], []>} : vector<16x72xf32>, vector<72x32xf32>, vector<16x32xf32> -> vector<16x32xf32>
    %cst_3 = arith.constant dense<0.000000e+00> : vector<16xf32>
    %3 = vector.multi_reduction <add>, %2, %cst_3 [1] : vector<16x32xf32> to vector<16xf32>
    %4 = vector.shape_cast %3 : vector<16xf32> to vector<16x1xf32>
    %cst_4 = arith.constant 3.125000e-02 : f32
    %5 = vector.broadcast %cst_4 : f32 to vector<16x1xf32>
    %6 = arith.mulf %4, %5 : vector<16x1xf32>
    %7 = arith.mulf %2, %2 : vector<16x32xf32>
    %cst_5 = arith.constant dense<0.000000e+00> : vector<16xf32>
    %8 = vector.multi_reduction <add>, %7, %cst_5 [1] : vector<16x32xf32> to vector<16xf32>
    %9 = vector.shape_cast %8 : vector<16xf32> to vector<16x1xf32>
    %cst_6 = arith.constant 3.125000e-02 : f32
    %10 = vector.broadcast %cst_6 : f32 to vector<16x1xf32>
    %11 = arith.mulf %9, %10 : vector<16x1xf32>
    %12 = arith.mulf %6, %6 : vector<16x1xf32>
    %13 = arith.subf %11, %12 : vector<16x1xf32>
    %c0_7 = arith.constant 0 : index
    %c0_8 = arith.constant 0 : index
    %14 = vector.load %arg3[%c0_7, %c0_8] : memref<16x1xf32, #tpu.memory_space<vmem>>, vector<16x1xf32>
    %cst_9 = arith.constant 9.99999974E-6 : f32
    %15 = vector.broadcast %cst_9 : f32 to vector<16x1xf32>
    %16 = arith.addf %13, %15 : vector<16x1xf32>
    %17 = math.rsqrt %16 : vector<16x1xf32>
    %18 = arith.mulf %14, %17 : vector<16x1xf32>
    %c0_10 = arith.constant 0 : index
    %c0_11 = arith.constant 0 : index
    %19 = vector.load %arg4[%c0_10, %c0_11] : memref<16x1xf32, #tpu.memory_space<vmem>>, vector<16x1xf32>
    %20 = arith.mulf %6, %18 : vector<16x1xf32>
    %21 = arith.subf %19, %20 : vector<16x1xf32>
    %22 = vector.broadcast %18 : vector<16x1xf32> to vector<16x32xf32>
    %23 = arith.mulf %2, %22 : vector<16x32xf32>
    %24 = vector.broadcast %21 : vector<16x1xf32> to vector<16x32xf32>
    %25 = arith.addf %23, %24 : vector<16x32xf32>
    %cst_12 = arith.constant 0.000000e+00 : f32
    %26 = vector.broadcast %cst_12 : f32 to vector<16x32xf32>
    %27 = arith.maximumf %25, %26 : vector<16x32xf32>
    %c0_13 = arith.constant 0 : index
    %c0_14 = arith.constant 0 : index
    %28 = vector.load %arg5[%c0_13, %c0_14] : memref<16x32xf32, #tpu.memory_space<vmem>>, vector<16x32xf32>
    tpu.vector_store %arg5[%c0_13, %c0_14], %27 {strides = array<i32>} : memref<16x32xf32, #tpu.memory_space<vmem>>, vector<16x32xf32>,
    return
  }
  func.func @transform_0(%arg0: i32) -> (i32, i32) {
    %c0_i32 = arith.constant 0 : i32
    %c0_i32_0 = arith.constant 0 : i32
    %c0_i32_1 = arith.constant 0 : i32
    return %c0_i32, %c0_i32_0 : i32, i32
  }
  func.func @transform_1(%arg0: i32) -> (i32, i32) {
    %c0_i32 = arith.constant 0 : i32
    %c0_i32_0 = arith.constant 0 : i32
    %c0_i32_1 = arith.constant 0 : i32
    return %c0_i32, %c0_i32_0 : i32, i32
  }
  func.func @transform_2(%arg0: i32) -> (i32, i32) {
    %c0_i32 = arith.constant 0 : i32
    %c0_i32_0 = arith.constant 0 : i32
    %c0_i32_1 = arith.constant 0 : i32
    return %c0_i32, %c0_i32_0 : i32, i32
  }
  func.func @transform_3(%arg0: i32) -> (i32, i32) {
    %c0_i32 = arith.constant 0 : i32
    %c0_i32_0 = arith.constant 0 : i32
    %c0_i32_1 = arith.constant 0 : i32
    return %c0_i32, %c0_i32_0 : i32, i32
  }
  func.func @transform_4(%arg0: i32) -> (i32, i32) {
    %c0_i32 = arith.constant 0 : i32
    %c0_i32_0 = arith.constant 0 : i32
    %c0_i32_1 = arith.constant 0 : i32
    return %c0_i32, %c0_i32_0 : i32, i32
  }
}

module attributes {stable_mosaic.version = 11 : i64} {
  func.func @_conv_bn_relu_kernel(%arg0: i32, %arg1: memref<144x32xf32, #tpu.memory_space<vmem>>, %arg2: memref<16x144xf32, #tpu.memory_space<vmem>>, %arg3: memref<16x1xf32, #tpu.memory_space<vmem>>, %arg4: memref<16x1xf32, #tpu.memory_space<vmem>>, %arg5: memref<16x32xf32, #tpu.memory_space<vmem>>) attributes {dimension_semantics = [#tpu.dimension_semantics<arbitrary>], iteration_bounds = array<i64: 1>, scalar_prefetch = 0 : i64, scratch_operands = 0 : i64, tpu.core_type = #tpu.core_type<tc>, window_params = [{pipeline_mode = #tpu.pipeline_mode<synchronous>, transform_indices = @transform_0, window_bounds = array<i64: 144, 32>}, {pipeline_mode = #tpu.pipeline_mode<synchronous>, transform_indices = @transform_1, window_bounds = array<i64: 16, 144>}, {pipeline_mode = #tpu.pipeline_mode<synchronous>, transform_indices = @transform_2, window_bounds = array<i64: 16, 1>}, {pipeline_mode = #tpu.pipeline_mode<synchronous>, transform_indices = @transform_3, window_bounds = array<i64: 16, 1>}, {pipeline_mode = #tpu.pipeline_mode<synchronous>, transform_indices = @transform_4, window_bounds = array<i64: 16, 32>}]} {
    %c0 = arith.constant 0 : index
    %c0_0 = arith.constant 0 : index
    %0 = vector.load %arg2[%c0, %c0_0] : memref<16x144xf32, #tpu.memory_space<vmem>>, vector<16x144xf32>
    %c0_1 = arith.constant 0 : index
    %c0_2 = arith.constant 0 : index
    %1 = vector.load %arg1[%c0_1, %c0_2] : memref<144x32xf32, #tpu.memory_space<vmem>>, vector<144x32xf32>
    %cst = arith.constant dense<0.000000e+00> : vector<16x32xf32>
    %2 = tpu.matmul %0, %1, %cst {dimension_numbers = #tpu.dot_dimension_numbers<[1], [0], [0], [1], [0, 0, 1, 1], [], []>} : vector<16x144xf32>, vector<144x32xf32>, vector<16x32xf32> -> vector<16x32xf32>
    %cst_3 = arith.constant dense<0.000000e+00> : vector<16xf32>
    %3 = vector.multi_reduction <add>, %2, %cst_3 [1] : vector<16x32xf32> to vector<16xf32>
    %4 = vector.shape_cast %3 : vector<16xf32> to vector<16x1xf32>
    %cst_4 = arith.constant 3.125000e-02 : f32
    %5 = vector.broadcast %cst_4 : f32 to vector<16x1xf32>
    %6 = arith.mulf %4, %5 : vector<16x1xf32>
    %7 = arith.mulf %2, %2 : vector<16x32xf32>
    %cst_5 = arith.constant dense<0.000000e+00> : vector<16xf32>
    %8 = vector.multi_reduction <add>, %7, %cst_5 [1] : vector<16x32xf32> to vector<16xf32>
    %9 = vector.shape_cast %8 : vector<16xf32> to vector<16x1xf32>
    %cst_6 = arith.constant 3.125000e-02 : f32
    %10 = vector.broadcast %cst_6 : f32 to vector<16x1xf32>
    %11 = arith.mulf %9, %10 : vector<16x1xf32>
    %12 = arith.mulf %6, %6 : vector<16x1xf32>
    %13 = arith.subf %11, %12 : vector<16x1xf32>
    %c0_7 = arith.constant 0 : index
    %c0_8 = arith.constant 0 : index
    %14 = vector.load %arg3[%c0_7, %c0_8] : memref<16x1xf32, #tpu.memory_space<vmem>>, vector<16x1xf32>
    %cst_9 = arith.constant 9.99999974E-6 : f32
    %15 = vector.broadcast %cst_9 : f32 to vector<16x1xf32>
    %16 = arith.addf %13, %15 : vector<16x1xf32>
    %17 = math.rsqrt %16 : vector<16x1xf32>
    %18 = arith.mulf %14, %17 : vector<16x1xf32>
    %c0_10 = arith.constant 0 : index
    %c0_11 = arith.constant 0 : index
    %19 = vector.load %arg4[%c0_10, %c0_11] : memref<16x1xf32, #tpu.memory_space<vmem>>, vector<16x1xf32>
    %20 = arith.mulf %6, %18 : vector<16x1xf32>
    %21 = arith.subf %19, %20 : vector<16x1xf32>
    %22 = vector.broadcast %18 : vector<16x1xf32> to vector<16x32xf32>
    %23 = arith.mulf %2, %22 : vector<16x32xf32>
    %24 = vector.broadcast %21 : vector<16x1xf32> to vector<16x32xf32>
    %25 = arith.addf %23, %24 : vector<16x32xf32>
    %cst_12 = arith.constant 0.000000e+00 : f32
    %26 = vector.broadcast %cst_12 : f32 to vector<16x32xf32>
    %27 = arith.maximumf %25, %26 : vector<16x32xf32>
    %c0_13 = arith.constant 0 : index
    %c0_14 = arith.constant 0 : index
    %28 = vector.load %arg5[%c0_13, %c0_14] : memref<16x32xf32, #tpu.memory_space<vmem>>, vector<16x32xf32>
    tpu.vector_store %arg5[%c0_13, %c0_14], %27 {strides = array<i32>} : memref<16x32xf32, #tpu.memory_space<vmem>>, vector<16x32xf32>,
    return
  }
  func.func @transform_0(%arg0: i32) -> (i32, i32) {
    %c0_i32 = arith.constant 0 : i32
    %c0_i32_0 = arith.constant 0 : i32
    %c0_i32_1 = arith.constant 0 : i32
    return %c0_i32, %c0_i32_0 : i32, i32
  }
  func.func @transform_1(%arg0: i32) -> (i32, i32) {
    %c0_i32 = arith.constant 0 : i32
    %c0_i32_0 = arith.constant 0 : i32
    %c0_i32_1 = arith.constant 0 : i32
    return %c0_i32, %c0_i32_0 : i32, i32
  }
  func.func @transform_2(%arg0: i32) -> (i32, i32) {
    %c0_i32 = arith.constant 0 : i32
    %c0_i32_0 = arith.constant 0 : i32
    %c0_i32_1 = arith.constant 0 : i32
    return %c0_i32, %c0_i32_0 : i32, i32
  }
  func.func @transform_3(%arg0: i32) -> (i32, i32) {
    %c0_i32 = arith.constant 0 : i32
    %c0_i32_0 = arith.constant 0 : i32
    %c0_i32_1 = arith.constant 0 : i32
    return %c0_i32, %c0_i32_0 : i32, i32
  }
  func.func @transform_4(%arg0: i32) -> (i32, i32) {
    %c0_i32 = arith.constant 0 : i32
    %c0_i32_0 = arith.constant 0 : i32
    %c0_i32_1 = arith.constant 0 : i32
    return %c0_i32, %c0_i32_0 : i32, i32
  }
}

module attributes {stable_mosaic.version = 11 : i64} {
  func.func @_conv_bn_relu_kernel(%arg0: i32, %arg1: memref<144x8xf32, #tpu.memory_space<vmem>>, %arg2: memref<32x144xf32, #tpu.memory_space<vmem>>, %arg3: memref<32x1xf32, #tpu.memory_space<vmem>>, %arg4: memref<32x1xf32, #tpu.memory_space<vmem>>, %arg5: memref<32x8xf32, #tpu.memory_space<vmem>>) attributes {dimension_semantics = [#tpu.dimension_semantics<arbitrary>], iteration_bounds = array<i64: 1>, scalar_prefetch = 0 : i64, scratch_operands = 0 : i64, tpu.core_type = #tpu.core_type<tc>, window_params = [{pipeline_mode = #tpu.pipeline_mode<synchronous>, transform_indices = @transform_0, window_bounds = array<i64: 144, 8>}, {pipeline_mode = #tpu.pipeline_mode<synchronous>, transform_indices = @transform_1, window_bounds = array<i64: 32, 144>}, {pipeline_mode = #tpu.pipeline_mode<synchronous>, transform_indices = @transform_2, window_bounds = array<i64: 32, 1>}, {pipeline_mode = #tpu.pipeline_mode<synchronous>, transform_indices = @transform_3, window_bounds = array<i64: 32, 1>}, {pipeline_mode = #tpu.pipeline_mode<synchronous>, transform_indices = @transform_4, window_bounds = array<i64: 32, 8>}]} {
    %c0 = arith.constant 0 : index
    %c0_0 = arith.constant 0 : index
    %0 = vector.load %arg2[%c0, %c0_0] : memref<32x144xf32, #tpu.memory_space<vmem>>, vector<32x144xf32>
    %c0_1 = arith.constant 0 : index
    %c0_2 = arith.constant 0 : index
    %1 = vector.load %arg1[%c0_1, %c0_2] : memref<144x8xf32, #tpu.memory_space<vmem>>, vector<144x8xf32>
    %cst = arith.constant dense<0.000000e+00> : vector<32x8xf32>
    %2 = tpu.matmul %0, %1, %cst {dimension_numbers = #tpu.dot_dimension_numbers<[1], [0], [0], [1], [0, 0, 1, 1], [], []>} : vector<32x144xf32>, vector<144x8xf32>, vector<32x8xf32> -> vector<32x8xf32>
    %cst_3 = arith.constant dense<0.000000e+00> : vector<32xf32>
    %3 = vector.multi_reduction <add>, %2, %cst_3 [1] : vector<32x8xf32> to vector<32xf32>
    %4 = vector.shape_cast %3 : vector<32xf32> to vector<32x1xf32>
    %cst_4 = arith.constant 1.250000e-01 : f32
    %5 = vector.broadcast %cst_4 : f32 to vector<32x1xf32>
    %6 = arith.mulf %4, %5 : vector<32x1xf32>
    %7 = arith.mulf %2, %2 : vector<32x8xf32>
    %cst_5 = arith.constant dense<0.000000e+00> : vector<32xf32>
    %8 = vector.multi_reduction <add>, %7, %cst_5 [1] : vector<32x8xf32> to vector<32xf32>
    %9 = vector.shape_cast %8 : vector<32xf32> to vector<32x1xf32>
    %cst_6 = arith.constant 1.250000e-01 : f32
    %10 = vector.broadcast %cst_6 : f32 to vector<32x1xf32>
    %11 = arith.mulf %9, %10 : vector<32x1xf32>
    %12 = arith.mulf %6, %6 : vector<32x1xf32>
    %13 = arith.subf %11, %12 : vector<32x1xf32>
    %c0_7 = arith.constant 0 : index
    %c0_8 = arith.constant 0 : index
    %14 = vector.load %arg3[%c0_7, %c0_8] : memref<32x1xf32, #tpu.memory_space<vmem>>, vector<32x1xf32>
    %cst_9 = arith.constant 9.99999974E-6 : f32
    %15 = vector.broadcast %cst_9 : f32 to vector<32x1xf32>
    %16 = arith.addf %13, %15 : vector<32x1xf32>
    %17 = math.rsqrt %16 : vector<32x1xf32>
    %18 = arith.mulf %14, %17 : vector<32x1xf32>
    %c0_10 = arith.constant 0 : index
    %c0_11 = arith.constant 0 : index
    %19 = vector.load %arg4[%c0_10, %c0_11] : memref<32x1xf32, #tpu.memory_space<vmem>>, vector<32x1xf32>
    %20 = arith.mulf %6, %18 : vector<32x1xf32>
    %21 = arith.subf %19, %20 : vector<32x1xf32>
    %22 = vector.broadcast %18 : vector<32x1xf32> to vector<32x8xf32>
    %23 = arith.mulf %2, %22 : vector<32x8xf32>
    %24 = vector.broadcast %21 : vector<32x1xf32> to vector<32x8xf32>
    %25 = arith.addf %23, %24 : vector<32x8xf32>
    %cst_12 = arith.constant 0.000000e+00 : f32
    %26 = vector.broadcast %cst_12 : f32 to vector<32x8xf32>
    %27 = arith.maximumf %25, %26 : vector<32x8xf32>
    %c0_13 = arith.constant 0 : index
    %c0_14 = arith.constant 0 : index
    %28 = vector.load %arg5[%c0_13, %c0_14] : memref<32x8xf32, #tpu.memory_space<vmem>>, vector<32x8xf32>
    tpu.vector_store %arg5[%c0_13, %c0_14], %27 {strides = array<i32>} : memref<32x8xf32, #tpu.memory_space<vmem>>, vector<32x8xf32>,
    return
  }
  func.func @transform_0(%arg0: i32) -> (i32, i32) {
    %c0_i32 = arith.constant 0 : i32
    %c0_i32_0 = arith.constant 0 : i32
    %c0_i32_1 = arith.constant 0 : i32
    return %c0_i32, %c0_i32_0 : i32, i32
  }
  func.func @transform_1(%arg0: i32) -> (i32, i32) {
    %c0_i32 = arith.constant 0 : i32
    %c0_i32_0 = arith.constant 0 : i32
    %c0_i32_1 = arith.constant 0 : i32
    return %c0_i32, %c0_i32_0 : i32, i32
  }
  func.func @transform_2(%arg0: i32) -> (i32, i32) {
    %c0_i32 = arith.constant 0 : i32
    %c0_i32_0 = arith.constant 0 : i32
    %c0_i32_1 = arith.constant 0 : i32
    return %c0_i32, %c0_i32_0 : i32, i32
  }
  func.func @transform_3(%arg0: i32) -> (i32, i32) {
    %c0_i32 = arith.constant 0 : i32
    %c0_i32_0 = arith.constant 0 : i32
    %c0_i32_1 = arith.constant 0 : i32
    return %c0_i32, %c0_i32_0 : i32, i32
  }
  func.func @transform_4(%arg0: i32) -> (i32, i32) {
    %c0_i32 = arith.constant 0 : i32
    %c0_i32_0 = arith.constant 0 : i32
    %c0_i32_1 = arith.constant 0 : i32
    return %c0_i32, %c0_i32_0 : i32, i32
  }
}

module attributes {stable_mosaic.version = 11 : i64} {
  func.func @_conv_bn_relu_kernel(%arg0: i32, %arg1: memref<288x8xf32, #tpu.memory_space<vmem>>, %arg2: memref<32x288xf32, #tpu.memory_space<vmem>>, %arg3: memref<32x1xf32, #tpu.memory_space<vmem>>, %arg4: memref<32x1xf32, #tpu.memory_space<vmem>>, %arg5: memref<32x8xf32, #tpu.memory_space<vmem>>) attributes {dimension_semantics = [#tpu.dimension_semantics<arbitrary>], iteration_bounds = array<i64: 1>, scalar_prefetch = 0 : i64, scratch_operands = 0 : i64, tpu.core_type = #tpu.core_type<tc>, window_params = [{pipeline_mode = #tpu.pipeline_mode<synchronous>, transform_indices = @transform_0, window_bounds = array<i64: 288, 8>}, {pipeline_mode = #tpu.pipeline_mode<synchronous>, transform_indices = @transform_1, window_bounds = array<i64: 32, 288>}, {pipeline_mode = #tpu.pipeline_mode<synchronous>, transform_indices = @transform_2, window_bounds = array<i64: 32, 1>}, {pipeline_mode = #tpu.pipeline_mode<synchronous>, transform_indices = @transform_3, window_bounds = array<i64: 32, 1>}, {pipeline_mode = #tpu.pipeline_mode<synchronous>, transform_indices = @transform_4, window_bounds = array<i64: 32, 8>}]} {
    %c0 = arith.constant 0 : index
    %c0_0 = arith.constant 0 : index
    %0 = vector.load %arg2[%c0, %c0_0] : memref<32x288xf32, #tpu.memory_space<vmem>>, vector<32x288xf32>
    %c0_1 = arith.constant 0 : index
    %c0_2 = arith.constant 0 : index
    %1 = vector.load %arg1[%c0_1, %c0_2] : memref<288x8xf32, #tpu.memory_space<vmem>>, vector<288x8xf32>
    %cst = arith.constant dense<0.000000e+00> : vector<32x8xf32>
    %2 = tpu.matmul %0, %1, %cst {dimension_numbers = #tpu.dot_dimension_numbers<[1], [0], [0], [1], [0, 0, 1, 1], [], []>} : vector<32x288xf32>, vector<288x8xf32>, vector<32x8xf32> -> vector<32x8xf32>
    %cst_3 = arith.constant dense<0.000000e+00> : vector<32xf32>
    %3 = vector.multi_reduction <add>, %2, %cst_3 [1] : vector<32x8xf32> to vector<32xf32>
    %4 = vector.shape_cast %3 : vector<32xf32> to vector<32x1xf32>
    %cst_4 = arith.constant 1.250000e-01 : f32
    %5 = vector.broadcast %cst_4 : f32 to vector<32x1xf32>
    %6 = arith.mulf %4, %5 : vector<32x1xf32>
    %7 = arith.mulf %2, %2 : vector<32x8xf32>
    %cst_5 = arith.constant dense<0.000000e+00> : vector<32xf32>
    %8 = vector.multi_reduction <add>, %7, %cst_5 [1] : vector<32x8xf32> to vector<32xf32>
    %9 = vector.shape_cast %8 : vector<32xf32> to vector<32x1xf32>
    %cst_6 = arith.constant 1.250000e-01 : f32
    %10 = vector.broadcast %cst_6 : f32 to vector<32x1xf32>
    %11 = arith.mulf %9, %10 : vector<32x1xf32>
    %12 = arith.mulf %6, %6 : vector<32x1xf32>
    %13 = arith.subf %11, %12 : vector<32x1xf32>
    %c0_7 = arith.constant 0 : index
    %c0_8 = arith.constant 0 : index
    %14 = vector.load %arg3[%c0_7, %c0_8] : memref<32x1xf32, #tpu.memory_space<vmem>>, vector<32x1xf32>
    %cst_9 = arith.constant 9.99999974E-6 : f32
    %15 = vector.broadcast %cst_9 : f32 to vector<32x1xf32>
    %16 = arith.addf %13, %15 : vector<32x1xf32>
    %17 = math.rsqrt %16 : vector<32x1xf32>
    %18 = arith.mulf %14, %17 : vector<32x1xf32>
    %c0_10 = arith.constant 0 : index
    %c0_11 = arith.constant 0 : index
    %19 = vector.load %arg4[%c0_10, %c0_11] : memref<32x1xf32, #tpu.memory_space<vmem>>, vector<32x1xf32>
    %20 = arith.mulf %6, %18 : vector<32x1xf32>
    %21 = arith.subf %19, %20 : vector<32x1xf32>
    %22 = vector.broadcast %18 : vector<32x1xf32> to vector<32x8xf32>
    %23 = arith.mulf %2, %22 : vector<32x8xf32>
    %24 = vector.broadcast %21 : vector<32x1xf32> to vector<32x8xf32>
    %25 = arith.addf %23, %24 : vector<32x8xf32>
    %cst_12 = arith.constant 0.000000e+00 : f32
    %26 = vector.broadcast %cst_12 : f32 to vector<32x8xf32>
    %27 = arith.maximumf %25, %26 : vector<32x8xf32>
    %c0_13 = arith.constant 0 : index
    %c0_14 = arith.constant 0 : index
    %28 = vector.load %arg5[%c0_13, %c0_14] : memref<32x8xf32, #tpu.memory_space<vmem>>, vector<32x8xf32>
    tpu.vector_store %arg5[%c0_13, %c0_14], %27 {strides = array<i32>} : memref<32x8xf32, #tpu.memory_space<vmem>>, vector<32x8xf32>,
    return
  }
  func.func @transform_0(%arg0: i32) -> (i32, i32) {
    %c0_i32 = arith.constant 0 : i32
    %c0_i32_0 = arith.constant 0 : i32
    %c0_i32_1 = arith.constant 0 : i32
    return %c0_i32, %c0_i32_0 : i32, i32
  }
  func.func @transform_1(%arg0: i32) -> (i32, i32) {
    %c0_i32 = arith.constant 0 : i32
    %c0_i32_0 = arith.constant 0 : i32
    %c0_i32_1 = arith.constant 0 : i32
    return %c0_i32, %c0_i32_0 : i32, i32
  }
  func.func @transform_2(%arg0: i32) -> (i32, i32) {
    %c0_i32 = arith.constant 0 : i32
    %c0_i32_0 = arith.constant 0 : i32
    %c0_i32_1 = arith.constant 0 : i32
    return %c0_i32, %c0_i32_0 : i32, i32
  }
  func.func @transform_3(%arg0: i32) -> (i32, i32) {
    %c0_i32 = arith.constant 0 : i32
    %c0_i32_0 = arith.constant 0 : i32
    %c0_i32_1 = arith.constant 0 : i32
    return %c0_i32, %c0_i32_0 : i32, i32
  }
  func.func @transform_4(%arg0: i32) -> (i32, i32) {
    %c0_i32 = arith.constant 0 : i32
    %c0_i32_0 = arith.constant 0 : i32
    %c0_i32_1 = arith.constant 0 : i32
    return %c0_i32, %c0_i32_0 : i32, i32
  }
}

module attributes {stable_mosaic.version = 11 : i64} {
  func.func @_conv_bn_relu_kernel(%arg0: i32, %arg1: memref<288x128xf32, #tpu.memory_space<vmem>>, %arg2: memref<16x288xf32, #tpu.memory_space<vmem>>, %arg3: memref<16x1xf32, #tpu.memory_space<vmem>>, %arg4: memref<16x1xf32, #tpu.memory_space<vmem>>, %arg5: memref<16x128xf32, #tpu.memory_space<vmem>>) attributes {dimension_semantics = [#tpu.dimension_semantics<arbitrary>], iteration_bounds = array<i64: 1>, scalar_prefetch = 0 : i64, scratch_operands = 0 : i64, tpu.core_type = #tpu.core_type<tc>, window_params = [{pipeline_mode = #tpu.pipeline_mode<synchronous>, transform_indices = @transform_0, window_bounds = array<i64: 288, 128>}, {pipeline_mode = #tpu.pipeline_mode<synchronous>, transform_indices = @transform_1, window_bounds = array<i64: 16, 288>}, {pipeline_mode = #tpu.pipeline_mode<synchronous>, transform_indices = @transform_2, window_bounds = array<i64: 16, 1>}, {pipeline_mode = #tpu.pipeline_mode<synchronous>, transform_indices = @transform_3, window_bounds = array<i64: 16, 1>}, {pipeline_mode = #tpu.pipeline_mode<synchronous>, transform_indices = @transform_4, window_bounds = array<i64: 16, 128>}]} {
    %c0 = arith.constant 0 : index
    %c0_0 = arith.constant 0 : index
    %0 = vector.load %arg2[%c0, %c0_0] : memref<16x288xf32, #tpu.memory_space<vmem>>, vector<16x288xf32>
    %c0_1 = arith.constant 0 : index
    %c0_2 = arith.constant 0 : index
    %1 = vector.load %arg1[%c0_1, %c0_2] : memref<288x128xf32, #tpu.memory_space<vmem>>, vector<288x128xf32>
    %cst = arith.constant dense<0.000000e+00> : vector<16x128xf32>
    %2 = tpu.matmul %0, %1, %cst {dimension_numbers = #tpu.dot_dimension_numbers<[1], [0], [0], [1], [0, 0, 1, 1], [], []>} : vector<16x288xf32>, vector<288x128xf32>, vector<16x128xf32> -> vector<16x128xf32>
    %cst_3 = arith.constant dense<0.000000e+00> : vector<16xf32>
    %3 = vector.multi_reduction <add>, %2, %cst_3 [1] : vector<16x128xf32> to vector<16xf32>
    %4 = vector.shape_cast %3 : vector<16xf32> to vector<16x1xf32>
    %cst_4 = arith.constant 7.812500e-03 : f32
    %5 = vector.broadcast %cst_4 : f32 to vector<16x1xf32>
    %6 = arith.mulf %4, %5 : vector<16x1xf32>
    %7 = arith.mulf %2, %2 : vector<16x128xf32>
    %cst_5 = arith.constant dense<0.000000e+00> : vector<16xf32>
    %8 = vector.multi_reduction <add>, %7, %cst_5 [1] : vector<16x128xf32> to vector<16xf32>
    %9 = vector.shape_cast %8 : vector<16xf32> to vector<16x1xf32>
    %cst_6 = arith.constant 7.812500e-03 : f32
    %10 = vector.broadcast %cst_6 : f32 to vector<16x1xf32>
    %11 = arith.mulf %9, %10 : vector<16x1xf32>
    %12 = arith.mulf %6, %6 : vector<16x1xf32>
    %13 = arith.subf %11, %12 : vector<16x1xf32>
    %c0_7 = arith.constant 0 : index
    %c0_8 = arith.constant 0 : index
    %14 = vector.load %arg3[%c0_7, %c0_8] : memref<16x1xf32, #tpu.memory_space<vmem>>, vector<16x1xf32>
    %cst_9 = arith.constant 9.99999974E-6 : f32
    %15 = vector.broadcast %cst_9 : f32 to vector<16x1xf32>
    %16 = arith.addf %13, %15 : vector<16x1xf32>
    %17 = math.rsqrt %16 : vector<16x1xf32>
    %18 = arith.mulf %14, %17 : vector<16x1xf32>
    %c0_10 = arith.constant 0 : index
    %c0_11 = arith.constant 0 : index
    %19 = vector.load %arg4[%c0_10, %c0_11] : memref<16x1xf32, #tpu.memory_space<vmem>>, vector<16x1xf32>
    %20 = arith.mulf %6, %18 : vector<16x1xf32>
    %21 = arith.subf %19, %20 : vector<16x1xf32>
    %22 = vector.broadcast %18 : vector<16x1xf32> to vector<16x128xf32>
    %23 = arith.mulf %2, %22 : vector<16x128xf32>
    %24 = vector.broadcast %21 : vector<16x1xf32> to vector<16x128xf32>
    %25 = arith.addf %23, %24 : vector<16x128xf32>
    %cst_12 = arith.constant 0.000000e+00 : f32
    %26 = vector.broadcast %cst_12 : f32 to vector<16x128xf32>
    %27 = arith.maximumf %25, %26 : vector<16x128xf32>
    %c0_13 = arith.constant 0 : index
    %c0_14 = arith.constant 0 : index
    %28 = vector.load %arg5[%c0_13, %c0_14] : memref<16x128xf32, #tpu.memory_space<vmem>>, vector<16x128xf32>
    tpu.vector_store %arg5[%c0_13, %c0_14], %27 {strides = array<i32>} : memref<16x128xf32, #tpu.memory_space<vmem>>, vector<16x128xf32>,
    return
  }
  func.func @transform_0(%arg0: i32) -> (i32, i32) {
    %c0_i32 = arith.constant 0 : i32
    %c0_i32_0 = arith.constant 0 : i32
    %c0_i32_1 = arith.constant 0 : i32
    return %c0_i32, %c0_i32_0 : i32, i32
  }
  func.func @transform_1(%arg0: i32) -> (i32, i32) {
    %c0_i32 = arith.constant 0 : i32
    %c0_i32_0 = arith.constant 0 : i32
    %c0_i32_1 = arith.constant 0 : i32
    return %c0_i32, %c0_i32_0 : i32, i32
  }
  func.func @transform_2(%arg0: i32) -> (i32, i32) {
    %c0_i32 = arith.constant 0 : i32
    %c0_i32_0 = arith.constant 0 : i32
    %c0_i32_1 = arith.constant 0 : i32
    return %c0_i32, %c0_i32_0 : i32, i32
  }
  func.func @transform_3(%arg0: i32) -> (i32, i32) {
    %c0_i32 = arith.constant 0 : i32
    %c0_i32_0 = arith.constant 0 : i32
    %c0_i32_1 = arith.constant 0 : i32
    return %c0_i32, %c0_i32_0 : i32, i32
  }
  func.func @transform_4(%arg0: i32) -> (i32, i32) {
    %c0_i32 = arith.constant 0 : i32
    %c0_i32_0 = arith.constant 0 : i32
    %c0_i32_1 = arith.constant 0 : i32
    return %c0_i32, %c0_i32_0 : i32, i32
  }
}

module attributes {stable_mosaic.version = 11 : i64} {
  func.func @_conv_bn_relu_kernel(%arg0: i32, %arg1: memref<144x128xf32, #tpu.memory_space<vmem>>, %arg2: memref<16x144xf32, #tpu.memory_space<vmem>>, %arg3: memref<16x1xf32, #tpu.memory_space<vmem>>, %arg4: memref<16x1xf32, #tpu.memory_space<vmem>>, %arg5: memref<16x128xf32, #tpu.memory_space<vmem>>) attributes {dimension_semantics = [#tpu.dimension_semantics<arbitrary>], iteration_bounds = array<i64: 1>, scalar_prefetch = 0 : i64, scratch_operands = 0 : i64, tpu.core_type = #tpu.core_type<tc>, window_params = [{pipeline_mode = #tpu.pipeline_mode<synchronous>, transform_indices = @transform_0, window_bounds = array<i64: 144, 128>}, {pipeline_mode = #tpu.pipeline_mode<synchronous>, transform_indices = @transform_1, window_bounds = array<i64: 16, 144>}, {pipeline_mode = #tpu.pipeline_mode<synchronous>, transform_indices = @transform_2, window_bounds = array<i64: 16, 1>}, {pipeline_mode = #tpu.pipeline_mode<synchronous>, transform_indices = @transform_3, window_bounds = array<i64: 16, 1>}, {pipeline_mode = #tpu.pipeline_mode<synchronous>, transform_indices = @transform_4, window_bounds = array<i64: 16, 128>}]} {
    %c0 = arith.constant 0 : index
    %c0_0 = arith.constant 0 : index
    %0 = vector.load %arg2[%c0, %c0_0] : memref<16x144xf32, #tpu.memory_space<vmem>>, vector<16x144xf32>
    %c0_1 = arith.constant 0 : index
    %c0_2 = arith.constant 0 : index
    %1 = vector.load %arg1[%c0_1, %c0_2] : memref<144x128xf32, #tpu.memory_space<vmem>>, vector<144x128xf32>
    %cst = arith.constant dense<0.000000e+00> : vector<16x128xf32>
    %2 = tpu.matmul %0, %1, %cst {dimension_numbers = #tpu.dot_dimension_numbers<[1], [0], [0], [1], [0, 0, 1, 1], [], []>} : vector<16x144xf32>, vector<144x128xf32>, vector<16x128xf32> -> vector<16x128xf32>
    %cst_3 = arith.constant dense<0.000000e+00> : vector<16xf32>
    %3 = vector.multi_reduction <add>, %2, %cst_3 [1] : vector<16x128xf32> to vector<16xf32>
    %4 = vector.shape_cast %3 : vector<16xf32> to vector<16x1xf32>
    %cst_4 = arith.constant 7.812500e-03 : f32
    %5 = vector.broadcast %cst_4 : f32 to vector<16x1xf32>
    %6 = arith.mulf %4, %5 : vector<16x1xf32>
    %7 = arith.mulf %2, %2 : vector<16x128xf32>
    %cst_5 = arith.constant dense<0.000000e+00> : vector<16xf32>
    %8 = vector.multi_reduction <add>, %7, %cst_5 [1] : vector<16x128xf32> to vector<16xf32>
    %9 = vector.shape_cast %8 : vector<16xf32> to vector<16x1xf32>
    %cst_6 = arith.constant 7.812500e-03 : f32
    %10 = vector.broadcast %cst_6 : f32 to vector<16x1xf32>
    %11 = arith.mulf %9, %10 : vector<16x1xf32>
    %12 = arith.mulf %6, %6 : vector<16x1xf32>
    %13 = arith.subf %11, %12 : vector<16x1xf32>
    %c0_7 = arith.constant 0 : index
    %c0_8 = arith.constant 0 : index
    %14 = vector.load %arg3[%c0_7, %c0_8] : memref<16x1xf32, #tpu.memory_space<vmem>>, vector<16x1xf32>
    %cst_9 = arith.constant 9.99999974E-6 : f32
    %15 = vector.broadcast %cst_9 : f32 to vector<16x1xf32>
    %16 = arith.addf %13, %15 : vector<16x1xf32>
    %17 = math.rsqrt %16 : vector<16x1xf32>
    %18 = arith.mulf %14, %17 : vector<16x1xf32>
    %c0_10 = arith.constant 0 : index
    %c0_11 = arith.constant 0 : index
    %19 = vector.load %arg4[%c0_10, %c0_11] : memref<16x1xf32, #tpu.memory_space<vmem>>, vector<16x1xf32>
    %20 = arith.mulf %6, %18 : vector<16x1xf32>
    %21 = arith.subf %19, %20 : vector<16x1xf32>
    %22 = vector.broadcast %18 : vector<16x1xf32> to vector<16x128xf32>
    %23 = arith.mulf %2, %22 : vector<16x128xf32>
    %24 = vector.broadcast %21 : vector<16x1xf32> to vector<16x128xf32>
    %25 = arith.addf %23, %24 : vector<16x128xf32>
    %cst_12 = arith.constant 0.000000e+00 : f32
    %26 = vector.broadcast %cst_12 : f32 to vector<16x128xf32>
    %27 = arith.maximumf %25, %26 : vector<16x128xf32>
    %c0_13 = arith.constant 0 : index
    %c0_14 = arith.constant 0 : index
    %28 = vector.load %arg5[%c0_13, %c0_14] : memref<16x128xf32, #tpu.memory_space<vmem>>, vector<16x128xf32>
    tpu.vector_store %arg5[%c0_13, %c0_14], %27 {strides = array<i32>} : memref<16x128xf32, #tpu.memory_space<vmem>>, vector<16x128xf32>,
    return
  }
  func.func @transform_0(%arg0: i32) -> (i32, i32) {
    %c0_i32 = arith.constant 0 : i32
    %c0_i32_0 = arith.constant 0 : i32
    %c0_i32_1 = arith.constant 0 : i32
    return %c0_i32, %c0_i32_0 : i32, i32
  }
  func.func @transform_1(%arg0: i32) -> (i32, i32) {
    %c0_i32 = arith.constant 0 : i32
    %c0_i32_0 = arith.constant 0 : i32
    %c0_i32_1 = arith.constant 0 : i32
    return %c0_i32, %c0_i32_0 : i32, i32
  }
  func.func @transform_2(%arg0: i32) -> (i32, i32) {
    %c0_i32 = arith.constant 0 : i32
    %c0_i32_0 = arith.constant 0 : i32
    %c0_i32_1 = arith.constant 0 : i32
    return %c0_i32, %c0_i32_0 : i32, i32
  }
  func.func @transform_3(%arg0: i32) -> (i32, i32) {
    %c0_i32 = arith.constant 0 : i32
    %c0_i32_0 = arith.constant 0 : i32
    %c0_i32_1 = arith.constant 0 : i32
    return %c0_i32, %c0_i32_0 : i32, i32
  }
  func.func @transform_4(%arg0: i32) -> (i32, i32) {
    %c0_i32 = arith.constant 0 : i32
    %c0_i32_0 = arith.constant 0 : i32
    %c0_i32_1 = arith.constant 0 : i32
    return %c0_i32, %c0_i32_0 : i32, i32
  }
}

module attributes {stable_mosaic.version = 11 : i64} {
  func.func @_conv_bn_relu_kernel(%arg0: i32, %arg1: memref<72x128xf32, #tpu.memory_space<vmem>>, %arg2: memref<16x72xf32, #tpu.memory_space<vmem>>, %arg3: memref<16x1xf32, #tpu.memory_space<vmem>>, %arg4: memref<16x1xf32, #tpu.memory_space<vmem>>, %arg5: memref<16x128xf32, #tpu.memory_space<vmem>>) attributes {dimension_semantics = [#tpu.dimension_semantics<arbitrary>], iteration_bounds = array<i64: 1>, scalar_prefetch = 0 : i64, scratch_operands = 0 : i64, tpu.core_type = #tpu.core_type<tc>, window_params = [{pipeline_mode = #tpu.pipeline_mode<synchronous>, transform_indices = @transform_0, window_bounds = array<i64: 72, 128>}, {pipeline_mode = #tpu.pipeline_mode<synchronous>, transform_indices = @transform_1, window_bounds = array<i64: 16, 72>}, {pipeline_mode = #tpu.pipeline_mode<synchronous>, transform_indices = @transform_2, window_bounds = array<i64: 16, 1>}, {pipeline_mode = #tpu.pipeline_mode<synchronous>, transform_indices = @transform_3, window_bounds = array<i64: 16, 1>}, {pipeline_mode = #tpu.pipeline_mode<synchronous>, transform_indices = @transform_4, window_bounds = array<i64: 16, 128>}]} {
    %c0 = arith.constant 0 : index
    %c0_0 = arith.constant 0 : index
    %0 = vector.load %arg2[%c0, %c0_0] : memref<16x72xf32, #tpu.memory_space<vmem>>, vector<16x72xf32>
    %c0_1 = arith.constant 0 : index
    %c0_2 = arith.constant 0 : index
    %1 = vector.load %arg1[%c0_1, %c0_2] : memref<72x128xf32, #tpu.memory_space<vmem>>, vector<72x128xf32>
    %cst = arith.constant dense<0.000000e+00> : vector<16x128xf32>
    %2 = tpu.matmul %0, %1, %cst {dimension_numbers = #tpu.dot_dimension_numbers<[1], [0], [0], [1], [0, 0, 1, 1], [], []>} : vector<16x72xf32>, vector<72x128xf32>, vector<16x128xf32> -> vector<16x128xf32>
    %cst_3 = arith.constant dense<0.000000e+00> : vector<16xf32>
    %3 = vector.multi_reduction <add>, %2, %cst_3 [1] : vector<16x128xf32> to vector<16xf32>
    %4 = vector.shape_cast %3 : vector<16xf32> to vector<16x1xf32>
    %cst_4 = arith.constant 7.812500e-03 : f32
    %5 = vector.broadcast %cst_4 : f32 to vector<16x1xf32>
    %6 = arith.mulf %4, %5 : vector<16x1xf32>
    %7 = arith.mulf %2, %2 : vector<16x128xf32>
    %cst_5 = arith.constant dense<0.000000e+00> : vector<16xf32>
    %8 = vector.multi_reduction <add>, %7, %cst_5 [1] : vector<16x128xf32> to vector<16xf32>
    %9 = vector.shape_cast %8 : vector<16xf32> to vector<16x1xf32>
    %cst_6 = arith.constant 7.812500e-03 : f32
    %10 = vector.broadcast %cst_6 : f32 to vector<16x1xf32>
    %11 = arith.mulf %9, %10 : vector<16x1xf32>
    %12 = arith.mulf %6, %6 : vector<16x1xf32>
    %13 = arith.subf %11, %12 : vector<16x1xf32>
    %c0_7 = arith.constant 0 : index
    %c0_8 = arith.constant 0 : index
    %14 = vector.load %arg3[%c0_7, %c0_8] : memref<16x1xf32, #tpu.memory_space<vmem>>, vector<16x1xf32>
    %cst_9 = arith.constant 9.99999974E-6 : f32
    %15 = vector.broadcast %cst_9 : f32 to vector<16x1xf32>
    %16 = arith.addf %13, %15 : vector<16x1xf32>
    %17 = math.rsqrt %16 : vector<16x1xf32>
    %18 = arith.mulf %14, %17 : vector<16x1xf32>
    %c0_10 = arith.constant 0 : index
    %c0_11 = arith.constant 0 : index
    %19 = vector.load %arg4[%c0_10, %c0_11] : memref<16x1xf32, #tpu.memory_space<vmem>>, vector<16x1xf32>
    %20 = arith.mulf %6, %18 : vector<16x1xf32>
    %21 = arith.subf %19, %20 : vector<16x1xf32>
    %22 = vector.broadcast %18 : vector<16x1xf32> to vector<16x128xf32>
    %23 = arith.mulf %2, %22 : vector<16x128xf32>
    %24 = vector.broadcast %21 : vector<16x1xf32> to vector<16x128xf32>
    %25 = arith.addf %23, %24 : vector<16x128xf32>
    %cst_12 = arith.constant 0.000000e+00 : f32
    %26 = vector.broadcast %cst_12 : f32 to vector<16x128xf32>
    %27 = arith.maximumf %25, %26 : vector<16x128xf32>
    %c0_13 = arith.constant 0 : index
    %c0_14 = arith.constant 0 : index
    %28 = vector.load %arg5[%c0_13, %c0_14] : memref<16x128xf32, #tpu.memory_space<vmem>>, vector<16x128xf32>
    tpu.vector_store %arg5[%c0_13, %c0_14], %27 {strides = array<i32>} : memref<16x128xf32, #tpu.memory_space<vmem>>, vector<16x128xf32>,
    return
  }
  func.func @transform_0(%arg0: i32) -> (i32, i32) {
    %c0_i32 = arith.constant 0 : i32
    %c0_i32_0 = arith.constant 0 : i32
    %c0_i32_1 = arith.constant 0 : i32
    return %c0_i32, %c0_i32_0 : i32, i32
  }
  func.func @transform_1(%arg0: i32) -> (i32, i32) {
    %c0_i32 = arith.constant 0 : i32
    %c0_i32_0 = arith.constant 0 : i32
    %c0_i32_1 = arith.constant 0 : i32
    return %c0_i32, %c0_i32_0 : i32, i32
  }
  func.func @transform_2(%arg0: i32) -> (i32, i32) {
    %c0_i32 = arith.constant 0 : i32
    %c0_i32_0 = arith.constant 0 : i32
    %c0_i32_1 = arith.constant 0 : i32
    return %c0_i32, %c0_i32_0 : i32, i32
  }
  func.func @transform_3(%arg0: i32) -> (i32, i32) {
    %c0_i32 = arith.constant 0 : i32
    %c0_i32_0 = arith.constant 0 : i32
    %c0_i32_1 = arith.constant 0 : i32
    return %c0_i32, %c0_i32_0 : i32, i32
  }
  func.func @transform_4(%arg0: i32) -> (i32, i32) {
    %c0_i32 = arith.constant 0 : i32
    %c0_i32_0 = arith.constant 0 : i32
    %c0_i32_1 = arith.constant 0 : i32
    return %c0_i32, %c0_i32_0 : i32, i32
  }
}

</mosaic_0001>

<bundles_post_ra>
// kernel: backbone_forward_pallas.19
= control target key start
LH: loop header
LB: loop body
LE: loop exit
PB: predicated region body
PF: predicated region fallthrough
CT: control target
= control target key end

     0   :  { %v187_v0 = vmov 0.0|0.0   ;;  %vm188_vm0 = vmmov 0   ;;  %v189_v4 = vmov 0.0   ;;  %vm27_vm1 = vcmask 588800   ;;  %s255_s0 = inlined_call_operand.vmem [shape: f32[72,128], index: 0, kind: input, shape index: {}]   ;;  %s256_s1 = inlined_call_operand.vmem [shape: f32[8,72], index: 1, kind: input, shape index: {}]   ;;  %s257_s2 = inlined_call_operand.vmem [shape: f32[8,1], index: 2, kind: input, shape index: {}]   ;;  %s258_s3 = inlined_call_operand.vmem [shape: f32[8,1], index: 3, kind: input, shape index: {}]   ;;  %s259_s4 = inlined_call_operand.vmem [shape: f32[8,128], index: 4, kind: output, shape index: {}]  }
   0x1   :  { %167 = vmatprep.subr.bf16.mxu0 %v187_v0  ;;  %v18_v1 = vld [vmem:[%s255_s0] sm:$0xff]  ;;  %v19_v2 = vld [vmem:[%s255_s0 + $0x8] sm:$0xff]  ;;  %v20_v3 = vld [vmem:[%s255_s0 + $0x10] sm:$0xff]  ;;  %164 = vmatprep.mubr.msk.f32.mxu0 %vm188_vm0, %v189_v4  ;;  %v190_v19 = vmov 0  }
   0x2   :  { %v168_v5 = vpack.c.bf16 %v19_v2, %v18_v1  ;;  %v21_v6 = vld [vmem:[%s255_s0 + $0x18] sm:$0xff]  ;;  %v22_v8 = vld [vmem:[%s255_s0 + $0x20] sm:$0xff]  ;;  %v23_v9 = vld [vmem:[%s255_s0 + $0x28] sm:$0xff]  ;;  %183 = vset.pattern.permute.xlu1 %v190_v19  ;;  %184 = vset.pattern.permute.xlu0 %v190_v19 }
   0x3   :  { %v171_v7 = vpack.c.bf16 %v21_v6, %v20_v3  ;;  %v174_v10 = vpack.c.bf16 %v23_v9, %v22_v8  ;;  %v24_v11 = vld [vmem:[%s255_s0 + $0x30] sm:$0xff]  ;;  %v25_v12 = vld [vmem:[%s255_s0 + $0x38] sm:$0xff]  ;;  %v26_v14 = vld [vmem:[%s255_s0 + $0x40] sm:$0xff] }
   0x4   :  { %169 = vmatpush3.bf16.msra.mxu0 %v168_v5  ;;  %v177_v13 = vpack.c.bf16 %v25_v12, %v24_v11  ;;  %v17_v15 = vld [vmem:[%s256_s1] sm:$0xff] }
   0x5   :  { %170 = vmatprep.subr.bf16.mxu0 %v187_v0  ;;  %v110_v27 = vld [vmem:[%s257_s2] sm:$0xff] }
   0x6   :  { %v114_v30 = vld [vmem:[%s258_s3] sm:$0xff] }
   0x8   :  { %172 = vmatpush3.bf16.msra.mxu0 %v171_v7 }
   0x9   :  { %173 = vmatprep.subr.bf16.mxu0 %v187_v0 }
   0xc   :  { %175 = vmatpush3.bf16.msra.mxu0 %v174_v10 }
   0xd   :  { %176 = vmatprep.subr.bf16.mxu0 %v187_v0 }
  0x10   :  { %178 = vmatpush3.bf16.msra.mxu0 %v177_v13 }
  0x11   :  { %162 = vmatprep.subr.mxu0 %v189_v4 }
  0x14   :  { %163 = vmatpush3.msra.mxu0 %v26_v14 }
  0x15   :  { %165 = vmatmul.mubr.msk.f32.vlgmr.msra.gmra.mrb[0].mxu0 %vm27_vm1, %v17_v15 }
  0xe8   :  { %v97_v16 = vpop.f32.mrb[0].mxu0 }
  0xe9   :  { %101 = vadd.xlane.f32.xlu0 %v97_v16  ;;  %v166_v17 = vpop.f32.mrb[1].mxu0  ;;  %v104_v18 = vmul.f32 %v97_v16, %v97_v16 }
  0xed   :  { %105 = vadd.xlane.f32.xlu0 %v104_v18 }
 0x176   :  { %v102_v20 = vpop.xlane.xlu0 %101 }
 0x177   :  { %v103_v21 = vmul.f32 0.0078125, %v102_v20 }
 0x179   :  { %v108_v23 = vmul.f32 %v103_v21, %v103_v21 }
 0x17a   :  { %v106_v22 = vpop.xlane.xlu0 %105 }
 0x17b   :  { %v107_v24 = vmul.f32 0.0078125, %v106_v22 }
 0x17d   :  { %v109_v25 = vsub.f32 %v107_v24, %v108_v23 }
 0x17f   :  { %v111_v26 = vadd.f32 1e-05, %v109_v25 }
 0x181   :  { %185 = vrsqrt.f32 %v111_v26 }
 0x18b   :  { %v186_v28 = vpop.eup %185 }
 0x18c   :  { %v113_v29 = vmul.f32 %v186_v28, %v110_v27 }
 0x18e   :  { %119 = vperm.xlu1 %183, %v113_v29   ;;  %v115_v31 = vmul.f32 %v113_v29, %v103_v21 }
 0x190   :  { %v116_v32 = vsub.f32 %v114_v30, %v115_v31 }
 0x192   :  { %125 = vperm.xlu1 %183, %v116_v32  }
 0x20d   :  { %v120_v33 = vpop.permute.xlu1 %119 }
 0x20e   :  { %v122_v34 = vmul.f32 %v120_v33, %v97_v16 }
 0x211   :  { %v126_v35 = vpop.permute.xlu1 %125 }
 0x212   :  { %v128_v36 = vadd.f32 %v126_v35, %v122_v34 }
 0x214   :  { %v129_v37 = vmax.f32 %v128_v36, 0.0 }
 0x216   :  { %130 = vst [vmem:[%s259_s4] sm:$0xff] %v129_v37 }

// kernel: backbone_forward_pallas.23
= control target key start
LH: loop header
LB: loop body
LE: loop exit
PB: predicated region body
PF: predicated region fallthrough
CT: control target
= control target key end

     0   :  { %vm28_vm0 = vcmask 588800   ;;  %vm110_vm1 = vcmask 261120   ;;  %v236_v23 = vmov 0   ;;  %s321_s0 = inlined_call_operand.vmem [shape: f32[72,32], index: 0, kind: input, shape index: {}]   ;;  %s322_s1 = inlined_call_operand.vmem [shape: f32[16,72], index: 1, kind: input, shape index: {}]   ;;  %s323_s2 = inlined_call_operand.vmem [shape: f32[16,1], index: 2, kind: input, shape index: {}]   ;;  %s324_s3 = inlined_call_operand.vmem [shape: f32[16,1], index: 3, kind: input, shape index: {}]   ;;  %s325_s4 = inlined_call_operand.vmem [shape: f32[16,32], index: 4, kind: output, shape index: {}]  }
   0x1   :  { %v19_v0 = vld [vmem:[%s321_s0] sm:$0xff]  ;;  %v20_v1 = vld [vmem:[%s321_s0 + $0x8] sm:$0xff]  ;;  %v21_v2 = vld [vmem:[%s321_s0 + $0x10] sm:$0xff]  ;;  %230 = vset.pattern.permute.xlu0 %v236_v23  ;;  %231 = vset.pattern.permute.xlu1 %v236_v23 }
   0x2   :  { %v213_v3 = vpack.c.bf16 %v20_v1, %v19_v0  ;;  %v22_v4 = vld [vmem:[%s321_s0 + $0x18] sm:$0xff]  ;;  %v23_v6 = vld [vmem:[%s321_s0 + $0x20] sm:$0xff]  ;;  %v24_v7 = vld [vmem:[%s321_s0 + $0x28] sm:$0xff] }
   0x3   :  { %v217_v5 = vpack.c.bf16 %v22_v4, %v21_v2  ;;  %v17_v8 = vld [vmem:[%s322_s1] sm:$0xff]  ;;  %v221_v9 = vpack.c.bf16 %v24_v7, %v23_v6  ;;  %v25_v10 = vld [vmem:[%s321_s0 + $0x30] sm:$0xff]  ;;  %v26_v11 = vld [vmem:[%s321_s0 + $0x38] sm:$0xff] }
   0x4   :  { %214 = vmatprep.subr.bf16.mxu0 %v213_v3  ;;  %210 = vmatprep.mubr.msk.f32.mxu0 %vm28_vm0, %v17_v8  ;;  %v225_v12 = vpack.c.bf16 %v26_v11, %v25_v10  ;;  %v27_v13 = vld [vmem:[%s321_s0 + $0x40] sm:$0xff]  ;;  %v18_v14 = vld [vmem:[%s322_s1 + $0x8] sm:$0xff] }
   0x5   :  { %216 = vmatpush3.bf16.msra.mxu0 %v213_v3  ;;  %v133_v38 = vld [vmem:[%s323_s2] sm:$0xff]  ;;  %v134_v41 = vld [vmem:[%s323_s2 + $0x8] sm:$0xff] }
   0x6   :  { %218 = vmatprep.subr.bf16.mxu0 %v217_v5  ;;  %v141_v45 = vld [vmem:[%s324_s3] sm:$0xff]  ;;  %v142_v48 = vld [vmem:[%s324_s3 + $0x8] sm:$0xff] }
   0x9   :  { %220 = vmatpush3.bf16.msra.mxu0 %v217_v5 }
   0xa   :  { %222 = vmatprep.subr.bf16.mxu0 %v221_v9 }
   0xd   :  { %224 = vmatpush3.bf16.msra.mxu0 %v221_v9 }
   0xe   :  { %226 = vmatprep.subr.bf16.mxu0 %v225_v12 }
  0x11   :  { %228 = vmatpush3.bf16.msra.mxu0 %v225_v12 }
  0x12   :  { %208 = vmatprep.subr.mxu0 %v27_v13 }
  0x15   :  { %209 = vmatpush3.msra.mxu0 %v27_v13 }
  0x16   :  { %211 = vmatmul.mubr.msk.f32.vlgmr.msra.gmra.mrb[0].mxu0 %vm28_vm0, %v18_v14 }
  0xe9   :  { %v212_v15 = vpop.f32.mrb[0].mxu0 }
  0xea   :  { %v101_v16 = vpop.f32.mrb[1].mxu0  ;;  %v120_v20 = vmul.f32 %v212_v15, %v212_v15  ;;  %v114_v21 = vsel %vm110_vm1, %v212_v15, 0.0 }
  0xeb   :  { %v111_v17 = vsel %vm110_vm1, %v101_v16, 0.0  ;;  %v119_v18 = vmul.f32 %v101_v16, %v101_v16 }
  0xec   :  { %112 = vadd.xlane.f32.xlu0 %v111_v17  ;;  %v124_v22 = vsel %vm110_vm1, %v120_v20, 0.0 }
  0xed   :  { %v121_v19 = vsel %vm110_vm1, %v119_v18, 0.0 }
  0xee   :  { %122 = vadd.xlane.f32.xlu1 %v121_v19 }
  0xf0   :  { %115 = vadd.xlane.f32.xlu0 %v114_v21 }
  0xf2   :  { %125 = vadd.xlane.f32.xlu1 %v124_v22 }
 0x179   :  { %v113_v24 = vpop.xlane.xlu0 %112 }
 0x17a   :  { %v117_v25 = vmul.f32 0.03125, %v113_v24 }
 0x17b   :  { %v123_v26 = vpop.xlane.xlu1 %122 }
 0x17c   :  { %v129_v27 = vmul.f32 %v117_v25, %v117_v25  ;;  %v127_v28 = vmul.f32 0.03125, %v123_v26 }
 0x17d   :  { %v116_v29 = vpop.xlane.xlu0 %115 }
 0x17e   :  { %v131_v30 = vsub.f32 %v127_v28, %v129_v27  ;;  %v118_v31 = vmul.f32 0.03125, %v116_v29 }
 0x17f   :  { %v126_v32 = vpop.xlane.xlu1 %125 }
 0x180   :  { %v135_v33 = vadd.f32 1e-05, %v131_v30  ;;  %v130_v34 = vmul.f32 %v118_v31, %v118_v31  ;;  %v128_v35 = vmul.f32 0.03125, %v126_v32 }
 0x182   :  { %232 = vrsqrt.f32 %v135_v33  ;;  %v132_v36 = vsub.f32 %v128_v35, %v130_v34 }
 0x184   :  { %v136_v37 = vadd.f32 1e-05, %v132_v36 }
 0x186   :  { %234 = vrsqrt.f32 %v136_v37 }
 0x18c   :  { %v233_v39 = vpop.eup %232 }
 0x18d   :  { %v139_v40 = vmul.f32 %v233_v39, %v133_v38 }
 0x18f   :  { %149 = vperm.xlu0 %230, %v139_v40   ;;  %v143_v44 = vmul.f32 %v139_v40, %v117_v25 }
 0x190   :  { %v235_v42 = vpop.eup %234 }
 0x191   :  { %v140_v43 = vmul.f32 %v235_v42, %v134_v41  ;;  %v145_v46 = vsub.f32 %v141_v45, %v143_v44 }
 0x193   :  { %154 = vperm.xlu1 %231, %v140_v43   ;;  %v144_v47 = vmul.f32 %v140_v43, %v118_v31 }
 0x195   :  { %v146_v49 = vsub.f32 %v142_v48, %v144_v47 }
 0x197   :  { %161 = vperm.xlu1 %231, %v145_v46  }
 0x19b   :  { %166 = vperm.xlu1 %231, %v146_v49  }
 0x20e   :  { %v150_v50 = vpop.permute.xlu0 %149 }
 0x20f   :  { %v157_v52 = vmul.f32 %v150_v50, %v101_v16 }
 0x212   :  { %v155_v51 = vpop.permute.xlu1 %154 }
 0x213   :  { %v158_v55 = vmul.f32 %v212_v15, %v155_v51 }
 0x216   :  { %v162_v53 = vpop.permute.xlu1 %161 }
 0x217   :  { %v169_v54 = vadd.f32 %v162_v53, %v157_v52 }
 0x219   :  { %v171_v56 = vmax.f32 %v169_v54, 0.0 }
 0x21a   :  { %v167_v57 = vpop.permute.xlu1 %166 }
 0x21b   :  { %173 = vst.msk [vmem:[%s325_s4] sm:$0xff] %vm110_vm1, %v171_v56  ;;  %v170_v58 = vadd.f32 %v167_v57, %v158_v55 }
 0x21d   :  { %v172_v59 = vmax.f32 %v170_v58, 0.0 }
 0x21f   :  { %174 = vst.msk [vmem:[%s325_s4 + $0x8] sm:$0xff] %vm110_vm1, %v172_v59 }

// kernel: backbone_forward_pallas.24
= control target key start
LH: loop header
LB: loop body
LE: loop exit
PB: predicated region body
PF: predicated region fallthrough
CT: control target
= control target key end

     0   :  { %v245_v0 = vmov 0.0|0.0   ;;  %vm39_vm0 = vcmask 130048   ;;  %vm121_vm1 = vcmask 261120   ;;  %v246_v42 = vmov 0   ;;  %s380_s0 = inlined_call_operand.vmem [shape: f32[144,32], index: 0, kind: input, shape index: {}]   ;;  %s381_s1 = inlined_call_operand.vmem [shape: f32[16,144], index: 1, kind: input, shape index: {}]   ;;  %s382_s2 = inlined_call_operand.vmem [shape: f32[16,1], index: 2, kind: input, shape index: {}]   ;;  %s383_s3 = inlined_call_operand.vmem [shape: f32[16,1], index: 3, kind: input, shape index: {}]   ;;  %s384_s4 = inlined_call_operand.vmem [shape: f32[16,32], index: 4, kind: output, shape index: {}]  }
   0x1   :  { %192 = vmatprep.subr.bf16.mxu0 %v245_v0  ;;  %v21_v1 = vld [vmem:[%s380_s0] sm:$0xff]  ;;  %v22_v2 = vld [vmem:[%s380_s0 + $0x8] sm:$0xff]  ;;  %219 = vmatprep.subr.bf16.mxu1 %v245_v0  ;;  %v23_v3 = vld [vmem:[%s380_s0 + $0x10] sm:$0xff] }
   0x2   :  { %v193_v4 = vpack.c.bf16 %v22_v2, %v21_v1  ;;  %v24_v5 = vld [vmem:[%s380_s0 + $0x18] sm:$0xff]  ;;  %v25_v7 = vld [vmem:[%s380_s0 + $0x20] sm:$0xff]  ;;  %v26_v8 = vld [vmem:[%s380_s0 + $0x28] sm:$0xff]  ;;  %239 = vset.pattern.permute.xlu0 %v246_v42  ;;  %240 = vset.pattern.permute.xlu1 %v246_v42 }
   0x3   :  { %v196_v6 = vpack.c.bf16 %v24_v5, %v23_v3  ;;  %v18_v9 = vld [vmem:[%s381_s1 + $0x8] sm:$0xff]  ;;  %v20_v10 = vld [vmem:[%s381_s1 + $0x18] sm:$0xff]  ;;  %v199_v11 = vpack.c.bf16 %v26_v8, %v25_v7  ;;  %v27_v12 = vld [vmem:[%s380_s0 + $0x30] sm:$0xff] }
   0x4   :  { %194 = vmatpush1.bf16.msra.mxu0 %v193_v4  ;;  %228 = vmatpush1.bf16.msra.mxu1 %v193_v4  ;;  %v28_v13 = vld [vmem:[%s380_s0 + $0x38] sm:$0xff]  ;;  %v29_v15 = vld [vmem:[%s380_s0 + $0x40] sm:$0xff]  ;;  %v30_v16 = vld [vmem:[%s380_s0 + $0x48] sm:$0xff] }
   0x5   :  { %195 = vmatprep.subr.bf16.mxu0 %v245_v0  ;;  %220 = vmatprep.subr.bf16.mxu1 %v245_v0  ;;  %v202_v14 = vpack.c.bf16 %v28_v13, %v27_v12  ;;  %v205_v17 = vpack.c.bf16 %v30_v16, %v29_v15  ;;  %v31_v18 = vld [vmem:[%s380_s0 + $0x50] sm:$0xff]  ;;  %v32_v19 = vld [vmem:[%s380_s0 + $0x58] sm:$0xff]  ;;  %v33_v21 = vld [vmem:[%s380_s0 + $0x60] sm:$0xff] }
   0x6   :  { %190 = vmatprep.mubr.msk.f32.mxu0 %vm39_vm0, %v18_v9  ;;  %191 = vmatprep.mubr.msk.f32.mxu1 %vm39_vm0, %v20_v10  ;;  %v208_v20 = vpack.c.bf16 %v32_v19, %v31_v18  ;;  %v34_v22 = vld [vmem:[%s380_s0 + $0x68] sm:$0xff]  ;;  %v35_v24 = vld [vmem:[%s380_s0 + $0x70] sm:$0xff]  ;;  %v36_v25 = vld [vmem:[%s380_s0 + $0x78] sm:$0xff] }
   0x7   :  { %v211_v23 = vpack.c.bf16 %v34_v22, %v33_v21  ;;  %v214_v26 = vpack.c.bf16 %v36_v25, %v35_v24  ;;  %v37_v27 = vld [vmem:[%s380_s0 + $0x80] sm:$0xff]  ;;  %v38_v28 = vld [vmem:[%s380_s0 + $0x88] sm:$0xff]  ;;  %v19_v31 = vld [vmem:[%s381_s1 + $0x10] sm:$0xff] }
   0x8   :  { %197 = vmatpush1.bf16.msra.mxu0 %v196_v6  ;;  %229 = vmatpush1.bf16.msra.mxu1 %v196_v6  ;;  %v217_v29 = vpack.c.bf16 %v38_v28, %v37_v27  ;;  %v17_v30 = vld [vmem:[%s381_s1] sm:$0xff]  ;;  %v145_v60 = vld [vmem:[%s382_s2 + $0x8] sm:$0xff] }
   0x9   :  { %198 = vmatprep.subr.bf16.mxu0 %v245_v0  ;;  %221 = vmatprep.subr.bf16.mxu1 %v245_v0  ;;  %v144_v57 = vld [vmem:[%s382_s2] sm:$0xff]  ;;  %v153_v3 = vld [vmem:[%s383_s3 + $0x8] sm:$0xff] }
   0xc   :  { %200 = vmatpush1.bf16.msra.mxu0 %v199_v11  ;;  %230 = vmatpush1.bf16.msra.mxu1 %v199_v11 }
   0xd   :  { %201 = vmatprep.subr.bf16.mxu0 %v245_v0  ;;  %222 = vmatprep.subr.bf16.mxu1 %v245_v0 }
  0x10   :  { %203 = vmatpush1.bf16.msra.mxu0 %v202_v14  ;;  %231 = vmatpush1.bf16.msra.mxu1 %v202_v14 }
  0x11   :  { %204 = vmatprep.subr.bf16.mxu0 %v245_v0  ;;  %223 = vmatprep.subr.bf16.mxu1 %v245_v0 }
  0x14   :  { %206 = vmatpush1.bf16.msra.mxu0 %v205_v17  ;;  %232 = vmatpush1.bf16.msra.mxu1 %v205_v17 }
  0x15   :  { %207 = vmatprep.subr.bf16.mxu0 %v245_v0  ;;  %224 = vmatprep.subr.bf16.mxu1 %v245_v0 }
  0x18   :  { %209 = vmatpush1.bf16.msra.mxu0 %v208_v20  ;;  %233 = vmatpush1.bf16.msra.mxu1 %v208_v20 }
  0x19   :  { %210 = vmatprep.subr.bf16.mxu0 %v245_v0  ;;  %225 = vmatprep.subr.bf16.mxu1 %v245_v0 }
  0x1c   :  { %212 = vmatpush1.bf16.msra.mxu0 %v211_v23  ;;  %234 = vmatpush1.bf16.msra.mxu1 %v211_v23 }
  0x1d   :  { %213 = vmatprep.subr.bf16.mxu0 %v245_v0  ;;  %226 = vmatprep.subr.bf16.mxu1 %v245_v0 }
  0x20   :  { %215 = vmatpush1.bf16.msra.mxu0 %v214_v26  ;;  %235 = vmatpush1.bf16.msra.mxu1 %v214_v26 }
  0x21   :  { %216 = vmatprep.subr.bf16.mxu0 %v245_v0  ;;  %227 = vmatprep.subr.bf16.mxu1 %v245_v0  ;;  %v152_v0 = vld [vmem:[%s383_s3] sm:$0xff] }
  0x24   :  { %218 = vmatpush1.bf16.msra.mxu0 %v217_v29  ;;  %236 = vmatpush1.bf16.msra.mxu1 %v217_v29 }
  0x27   :  { %111 = vmatmul.mubr.f32.vlgmr.msra.gmra.mrb[0].mxu0 %v17_v30  ;;  %116 = vmatmul.mubr.f32.vlgmr.msra.gmra.mrb[0].mxu1 %v19_v31 }
  0xfa   :  { %v112_v32 = vpop.f32.mrb[0].mxu0  ;;  %v117_v33 = vpop.f32.mrb[0].mxu1 }
  0xfb   :  { %v114_v34 = vpop.f32.mrb[1].mxu0  ;;  %v122_v35 = vsel %vm121_vm1, %v112_v32, 0.0  ;;  %v119_v36 = vpop.f32.mrb[1].mxu1  ;;  %v130_v37 = vmul.f32 %v112_v32, %v112_v32  ;;  %v131_v38 = vmul.f32 %v117_v33, %v117_v33  ;;  %v125_v40 = vsel %vm121_vm1, %v117_v33, 0.0 }
  0xfc   :  { %123 = vadd.xlane.f32.xlu0 %v122_v35 }
  0xfd   :  { %v132_v39 = vsel %vm121_vm1, %v130_v37, 0.0  ;;  %v135_v41 = vsel %vm121_vm1, %v131_v38, 0.0 }
  0xfe   :  { %133 = vadd.xlane.f32.xlu1 %v132_v39 }
 0x100   :  { %126 = vadd.xlane.f32.xlu0 %v125_v40 }
 0x102   :  { %136 = vadd.xlane.f32.xlu1 %v135_v41 }
 0x189   :  { %v124_v43 = vpop.xlane.xlu0 %123 }
 0x18a   :  { %v128_v44 = vmul.f32 0.03125, %v124_v43 }
 0x18b   :  { %v134_v45 = vpop.xlane.xlu1 %133 }
 0x18c   :  { %v140_v46 = vmul.f32 %v128_v44, %v128_v44  ;;  %v138_v47 = vmul.f32 0.03125, %v134_v45 }
 0x18d   :  { %v127_v48 = vpop.xlane.xlu0 %126 }
 0x18e   :  { %v142_v49 = vsub.f32 %v138_v47, %v140_v46  ;;  %v129_v50 = vmul.f32 0.03125, %v127_v48 }
 0x18f   :  { %v137_v51 = vpop.xlane.xlu1 %136 }
 0x190   :  { %v146_v52 = vadd.f32 1e-05, %v142_v49  ;;  %v141_v53 = vmul.f32 %v129_v50, %v129_v50  ;;  %v139_v54 = vmul.f32 0.03125, %v137_v51 }
 0x192   :  { %241 = vrsqrt.f32 %v146_v52  ;;  %v143_v55 = vsub.f32 %v139_v54, %v141_v53 }
 0x194   :  { %v147_v56 = vadd.f32 1e-05, %v143_v55 }
 0x196   :  { %243 = vrsqrt.f32 %v147_v56 }
 0x19c   :  { %v242_v58 = vpop.eup %241 }
 0x19d   :  { %v150_v59 = vmul.f32 %v242_v58, %v144_v57 }
 0x19f   :  { %160 = vperm.xlu0 %239, %v150_v59   ;;  %v154_v63 = vmul.f32 %v150_v59, %v128_v44 }
 0x1a0   :  { %v244_v61 = vpop.eup %243 }
 0x1a1   :  { %v151_v62 = vmul.f32 %v244_v61, %v145_v60  ;;  %v156_v1 = vsub.f32 %v152_v0, %v154_v63 }
 0x1a3   :  { %165 = vperm.xlu1 %240, %v151_v62   ;;  %v155_v2 = vmul.f32 %v151_v62, %v129_v50 }
 0x1a5   :  { %v157_v4 = vsub.f32 %v153_v3, %v155_v2 }
 0x1a7   :  { %172 = vperm.xlu1 %240, %v156_v1  }
 0x1ab   :  { %177 = vperm.xlu1 %240, %v157_v4  }
 0x21e   :  { %v161_v5 = vpop.permute.xlu0 %160 }
 0x21f   :  { %v168_v7 = vmul.f32 %v161_v5, %v112_v32 }
 0x222   :  { %v166_v6 = vpop.permute.xlu1 %165 }
 0x223   :  { %v169_v10 = vmul.f32 %v166_v6, %v117_v33 }
 0x226   :  { %v173_v8 = vpop.permute.xlu1 %172 }
 0x227   :  { %v180_v9 = vadd.f32 %v173_v8, %v168_v7 }
 0x229   :  { %v182_v11 = vmax.f32 %v180_v9, 0.0 }
 0x22a   :  { %v178_v12 = vpop.permute.xlu1 %177 }
 0x22b   :  { %184 = vst.msk [vmem:[%s384_s4] sm:$0xff] %vm121_vm1, %v182_v11  ;;  %v181_v13 = vadd.f32 %v178_v12, %v169_v10 }
 0x22d   :  { %v183_v14 = vmax.f32 %v181_v13, 0.0 }
 0x22f   :  { %185 = vst.msk [vmem:[%s384_s4 + $0x8] sm:$0xff] %vm121_vm1, %v183_v14 }

// kernel: backbone_forward_pallas.29
= control target key start
LH: loop header
LB: loop body
LE: loop exit
PB: predicated region body
PF: predicated region fallthrough
CT: control target
= control target key end

     0   :  { %v335_v0 = vmov 0.0|0.0   ;;  %vm43_vm0 = vcmask 130048   ;;  %vm141_vm1 = vcmask 64512   ;;  %v336_v56 = vmov 0   ;;  %s534_s0 = inlined_call_operand.vmem [shape: f32[144,8], index: 0, kind: input, shape index: {}]   ;;  %s535_s1 = inlined_call_operand.vmem [shape: f32[32,144], index: 1, kind: input, shape index: {}]   ;;  %s536_s2 = inlined_call_operand.vmem [shape: f32[32,1], index: 2, kind: input, shape index: {}]   ;;  %s537_s3 = inlined_call_operand.vmem [shape: f32[32,1], index: 3, kind: input, shape index: {}]   ;;  %s538_s4 = inlined_call_operand.vmem [shape: f32[32,8], index: 4, kind: output, shape index: {}]  }
   0x1   :  { %278 = vmatprep.subr.bf16.mxu0 %v335_v0  ;;  %305 = vmatprep.subr.bf16.mxu1 %v335_v0  ;;  %v25_v1 = vld [vmem:[%s534_s0] sm:$0xff]  ;;  %v26_v2 = vld [vmem:[%s534_s0 + $0x8] sm:$0xff]  ;;  %v27_v3 = vld [vmem:[%s534_s0 + $0x10] sm:$0xff] }
   0x2   :  { %v279_v4 = vpack.c.bf16 %v26_v2, %v25_v1  ;;  %v28_v5 = vld [vmem:[%s534_s0 + $0x18] sm:$0xff]  ;;  %v29_v7 = vld [vmem:[%s534_s0 + $0x20] sm:$0xff]  ;;  %v30_v8 = vld [vmem:[%s534_s0 + $0x28] sm:$0xff]  ;;  %325 = vset.pattern.permute.xlu0 %v336_v56  ;;  %326 = vset.pattern.permute.xlu1 %v336_v56 }
   0x3   :  { %v282_v6 = vpack.c.bf16 %v28_v5, %v27_v3  ;;  %v18_v9 = vld [vmem:[%s535_s1 + $0x8] sm:$0xff]  ;;  %v285_v11 = vpack.c.bf16 %v30_v8, %v29_v7  ;;  %v31_v12 = vld [vmem:[%s534_s0 + $0x30] sm:$0xff]  ;;  %v32_v13 = vld [vmem:[%s534_s0 + $0x38] sm:$0xff] }
   0x4   :  { %280 = vmatpush1.bf16.msra.mxu0 %v279_v4  ;;  %314 = vmatpush1.bf16.msra.mxu1 %v279_v4  ;;  %v22_v10 = vld [vmem:[%s535_s1 + $0x28] sm:$0xff]  ;;  %v288_v14 = vpack.c.bf16 %v32_v13, %v31_v12  ;;  %v33_v15 = vld [vmem:[%s534_s0 + $0x40] sm:$0xff]  ;;  %v35_v18 = vld [vmem:[%s534_s0 + $0x50] sm:$0xff] }
   0x5   :  { %281 = vmatprep.subr.bf16.mxu0 %v335_v0  ;;  %306 = vmatprep.subr.bf16.mxu1 %v335_v0  ;;  %v34_v16 = vld [vmem:[%s534_s0 + $0x48] sm:$0xff]  ;;  %v36_v19 = vld [vmem:[%s534_s0 + $0x58] sm:$0xff]  ;;  %v37_v21 = vld [vmem:[%s534_s0 + $0x60] sm:$0xff] }
   0x6   :  { %274 = vmatprep.mubr.msk.f32.mxu0 %vm43_vm0, %v18_v9  ;;  %276 = vmatprep.mubr.msk.f32.mxu1 %vm43_vm0, %v22_v10  ;;  %v291_v17 = vpack.c.bf16 %v34_v16, %v33_v15  ;;  %v294_v20 = vpack.c.bf16 %v36_v19, %v35_v18  ;;  %v38_v22 = vld [vmem:[%s534_s0 + $0x68] sm:$0xff]  ;;  %v39_v24 = vld [vmem:[%s534_s0 + $0x70] sm:$0xff]  ;;  %v40_v25 = vld [vmem:[%s534_s0 + $0x78] sm:$0xff] }
   0x7   :  { %v297_v23 = vpack.c.bf16 %v38_v22, %v37_v21  ;;  %v300_v26 = vpack.c.bf16 %v40_v25, %v39_v24  ;;  %v41_v27 = vld [vmem:[%s534_s0 + $0x80] sm:$0xff]  ;;  %v42_v28 = vld [vmem:[%s534_s0 + $0x88] sm:$0xff]  ;;  %v24_v32 = vld [vmem:[%s535_s1 + $0x38] sm:$0xff] }
   0x8   :  { %283 = vmatpush1.bf16.msra.mxu0 %v282_v6  ;;  %315 = vmatpush1.bf16.msra.mxu1 %v282_v6  ;;  %v303_v29 = vpack.c.bf16 %v42_v28, %v41_v27  ;;  %v17_v30 = vld [vmem:[%s535_s1] sm:$0xff]  ;;  %v20_v33 = vld [vmem:[%s535_s1 + $0x18] sm:$0xff]  ;;  %v23_v34 = vld [vmem:[%s535_s1 + $0x30] sm:$0xff] }
   0x9   :  { %284 = vmatprep.subr.bf16.mxu0 %v335_v0  ;;  %307 = vmatprep.subr.bf16.mxu1 %v335_v0  ;;  %v21_v31 = vld [vmem:[%s535_s1 + $0x20] sm:$0xff]  ;;  %v19_v35 = vld [vmem:[%s535_s1 + $0x10] sm:$0xff]  ;;  %v187_v28 = vld [vmem:[%s536_s2 + $0x8] sm:$0xff] }
   0xa   :  { %v188_v24 = vld [vmem:[%s536_s2 + $0x10] sm:$0xff] }
   0xc   :  { %286 = vmatpush1.bf16.msra.mxu0 %v285_v11  ;;  %316 = vmatpush1.bf16.msra.mxu1 %v285_v11 }
   0xd   :  { %287 = vmatprep.subr.bf16.mxu0 %v335_v0  ;;  %308 = vmatprep.subr.bf16.mxu1 %v335_v0 }
  0x10   :  { %289 = vmatpush1.bf16.msra.mxu0 %v288_v14  ;;  %317 = vmatpush1.bf16.msra.mxu1 %v288_v14 }
  0x11   :  { %290 = vmatprep.subr.bf16.mxu0 %v335_v0  ;;  %309 = vmatprep.subr.bf16.mxu1 %v335_v0 }
  0x14   :  { %292 = vmatpush1.bf16.msra.mxu0 %v291_v17  ;;  %318 = vmatpush1.bf16.msra.mxu1 %v291_v17 }
  0x15   :  { %293 = vmatprep.subr.bf16.mxu0 %v335_v0  ;;  %310 = vmatprep.subr.bf16.mxu1 %v335_v0 }
  0x18   :  { %295 = vmatpush1.bf16.msra.mxu0 %v294_v20  ;;  %319 = vmatpush1.bf16.msra.mxu1 %v294_v20  ;;  %v186_v20 = vld [vmem:[%s536_s2] sm:$0xff] }
  0x19   :  { %296 = vmatprep.subr.bf16.mxu0 %v335_v0  ;;  %311 = vmatprep.subr.bf16.mxu1 %v335_v0 }
  0x1c   :  { %298 = vmatpush1.bf16.msra.mxu0 %v297_v23  ;;  %320 = vmatpush1.bf16.msra.mxu1 %v297_v23 }
  0x1d   :  { %299 = vmatprep.subr.bf16.mxu0 %v335_v0  ;;  %312 = vmatprep.subr.bf16.mxu1 %v335_v0 }
  0x20   :  { %301 = vmatpush1.bf16.msra.mxu0 %v300_v26  ;;  %321 = vmatpush1.bf16.msra.mxu1 %v300_v26 }
  0x21   :  { %302 = vmatprep.subr.bf16.mxu0 %v335_v0  ;;  %313 = vmatprep.subr.bf16.mxu1 %v335_v0 }
  0x24   :  { %304 = vmatpush1.bf16.msra.mxu0 %v303_v29  ;;  %322 = vmatpush1.bf16.msra.mxu1 %v303_v29 }
  0x27   :  { %121 = vmatmul.mubr.f32.vlgmr.msra.gmra.mrb[0].mxu0 %v17_v30  ;;  %131 = vmatmul.mubr.f32.vlgmr.msra.gmra.mrb[0].mxu1 %v21_v31  ;;  %v189_v31 = vld [vmem:[%s536_s2 + $0x18] sm:$0xff] }
  0x28   :  { %277 = vmatprep.mubr.msk.f32.mxu1 %vm43_vm0, %v24_v32  ;;  %275 = vmatprep.mubr.msk.f32.mxu0 %vm43_vm0, %v20_v33 }
  0x2b   :  { %136 = vmatmul.mubr.f32.gmra.mrb[2].mxu1 %v23_v34  ;;  %126 = vmatmul.mubr.f32.gmra.mrb[2].mxu0 %v19_v35  ;;  %v202_v34 = vld [vmem:[%s537_s3] sm:$0xff] }
  0xfa   :  { %v462_v36 = vpop.f32.mrb[0].mxu0  ;;  %v464_v37 = vpop.f32.mrb[0].mxu1 }
  0xfb   :  { %v124_v38 = vpop.f32.mrb[1].mxu0  ;;  %v148_v39 = vsel %vm141_vm1, %v464_v37, 0.0  ;;  %v142_v40 = vsel %vm141_vm1, %v462_v36, 0.0  ;;  %v134_v41 = vpop.f32.mrb[1].mxu1  ;;  %v158_v42 = vmul.f32 %v462_v36, %v462_v36  ;;  %v160_v53 = vmul.f32 %v464_v37, %v464_v37 }
  0xfc   :  { %149 = vadd.xlane.f32.xlu1 %v148_v39  ;;  %143 = vadd.xlane.f32.xlu0 %v142_v40  ;;  %v204_v39 = vld [vmem:[%s537_s3 + $0x10] sm:$0xff] }
  0xfd   :  { %v162_v46 = vsel %vm141_vm1, %v158_v42, 0.0  ;;  %v168_v55 = vsel %vm141_vm1, %v160_v53, 0.0  ;;  %v203_v42 = vld [vmem:[%s537_s3 + $0x8] sm:$0xff] }
  0xfe   :  { %v472_v43 = vpop.f32.mrb[2].mxu1  ;;  %v474_v44 = vpop.f32.mrb[2].mxu0 }
  0xff   :  { %v151_v45 = vsel %vm141_vm1, %v472_v43, 0.0  ;;  %v129_v47 = vpop.f32.mrb[3].mxu0  ;;  %v159_v48 = vmul.f32 %v474_v44, %v474_v44  ;;  %v139_v49 = vpop.f32.mrb[3].mxu1  ;;  %v145_v51 = vsel %vm141_vm1, %v474_v44, 0.0  ;;  %v161_v52 = vmul.f32 %v472_v43, %v472_v43 }
 0x100   :  { %152 = vadd.xlane.f32.xlu1 %v151_v45  ;;  %163 = vadd.xlane.f32.xlu0 %v162_v46  ;;  %v205_v47 = vld [vmem:[%s537_s3 + $0x18] sm:$0xff] }
 0x101   :  { %v165_v50 = vsel %vm141_vm1, %v159_v48, 0.0  ;;  %v171_v54 = vsel %vm141_vm1, %v161_v52, 0.0 }
 0x104   :  { %166 = vadd.xlane.f32.xlu1 %v165_v50  ;;  %146 = vadd.xlane.f32.xlu0 %v145_v51 }
 0x108   :  { %172 = vadd.xlane.f32.xlu1 %v171_v54  ;;  %169 = vadd.xlane.f32.xlu0 %v168_v55 }
 0x189   :  { %v150_v57 = vpop.xlane.xlu1 %149  ;;  %v144_v58 = vpop.xlane.xlu0 %143 }
 0x18a   :  { %v154_v59 = vmul.f32 0.125, %v144_v58  ;;  %v156_v3 = vmul.f32 0.125, %v150_v57 }
 0x18c   :  { %v178_v62 = vmul.f32 %v154_v59, %v154_v59  ;;  %v180_v11 = vmul.f32 %v156_v3, %v156_v3 }
 0x18d   :  { %v153_v60 = vpop.xlane.xlu1 %152  ;;  %v164_v61 = vpop.xlane.xlu0 %163 }
 0x18e   :  { %v174_v63 = vmul.f32 0.125, %v164_v61  ;;  %v157_v6 = vmul.f32 0.125, %v153_v60 }
 0x190   :  { %v182_v0 = vsub.f32 %v174_v63, %v178_v62  ;;  %v181_v13 = vmul.f32 %v157_v6, %v157_v6 }
 0x191   :  { %v167_v1 = vpop.xlane.xlu1 %166  ;;  %v147_v2 = vpop.xlane.xlu0 %146 }
 0x192   :  { %v190_v4 = vadd.f32 1e-05, %v182_v0  ;;  %v155_v5 = vmul.f32 0.125, %v147_v2  ;;  %v175_v7 = vmul.f32 0.125, %v167_v1 }
 0x194   :  { %327 = vrsqrt.f32 %v190_v4  ;;  %v179_v8 = vmul.f32 %v155_v5, %v155_v5 }
 0x195   :  { %v173_v9 = vpop.xlane.xlu1 %172  ;;  %v170_v10 = vpop.xlane.xlu0 %169 }
 0x196   :  { %v176_v12 = vmul.f32 0.125, %v170_v10  ;;  %v183_v14 = vsub.f32 %v175_v7, %v179_v8  ;;  %v177_v15 = vmul.f32 0.125, %v173_v9 }
 0x198   :  { %v184_v16 = vsub.f32 %v176_v12, %v180_v11  ;;  %v191_v18 = vadd.f32 1e-05, %v183_v14  ;;  %v185_v19 = vsub.f32 %v177_v15, %v181_v13 }
 0x19a   :  { %v192_v17 = vadd.f32 1e-05, %v184_v16  ;;  %v193_v22 = vadd.f32 1e-05, %v185_v19 }
 0x19c   :  { %329 = vrsqrt.f32 %v192_v17 }
 0x19d   :  { %331 = vrsqrt.f32 %v191_v18 }
 0x19e   :  { %v328_v21 = vpop.eup %327  ;;  %333 = vrsqrt.f32 %v193_v22 }
 0x19f   :  { %v198_v23 = vmul.f32 %v328_v21, %v186_v20 }
 0x1a1   :  { %216 = vperm.xlu0 %325, %v198_v23   ;;  %v206_v33 = vmul.f32 %v198_v23, %v154_v59 }
 0x1a3   :  { %v210_v35 = vsub.f32 %v202_v34, %v206_v33 }
 0x1a6   :  { %v330_v25 = vpop.eup %329 }
 0x1a7   :  { %v200_v26 = vmul.f32 %v330_v25, %v188_v24  ;;  %v332_v27 = vpop.eup %331 }
 0x1a8   :  { %v199_v29 = vmul.f32 %v332_v27, %v187_v28  ;;  %v334_v30 = vpop.eup %333 }
 0x1a9   :  { %226 = vperm.xlu1 %326, %v200_v26   ;;  %v201_v32 = vmul.f32 %v334_v30, %v189_v31  ;;  %v208_v38 = vmul.f32 %v200_v26, %v156_v3 }
 0x1aa   :  { %v207_v40 = vmul.f32 %v199_v29, %v155_v5 }
 0x1ab   :  { %v212_v41 = vsub.f32 %v204_v39, %v208_v38  ;;  %v209_v46 = vmul.f32 %v201_v32, %v157_v6 }
 0x1ac   :  { %v211_v45 = vsub.f32 %v203_v42, %v207_v40 }
 0x1ad   :  { %221 = vperm.xlu1 %326, %v199_v29   ;;  %v213_v48 = vsub.f32 %v205_v47, %v209_v46 }
 0x1b1   :  { %231 = vperm.xlu1 %326, %v201_v32  }
 0x1b5   :  { %240 = vperm.xlu1 %326, %v210_v35  }
 0x1b9   :  { %250 = vperm.xlu1 %326, %v212_v41  }
 0x1bd   :  { %245 = vperm.xlu1 %326, %v211_v45  }
 0x1c1   :  { %255 = vperm.xlu1 %326, %v213_v48  }
 0x220   :  { %v217_v51 = vpop.permute.xlu0 %216 }
 0x221   :  { %v234_v53 = vmul.f32 %v217_v51, %v462_v36 }
 0x228   :  { %v227_v49 = vpop.permute.xlu1 %226 }
 0x229   :  { %v236_v56 = vmul.f32 %v227_v49, %v464_v37 }
 0x22c   :  { %v222_v50 = vpop.permute.xlu1 %221 }
 0x22d   :  { %v235_v60 = vmul.f32 %v222_v50, %v474_v44 }
 0x230   :  { %v232_v52 = vpop.permute.xlu1 %231 }
 0x231   :  { %v237_v37 = vmul.f32 %v232_v52, %v472_v43 }
 0x234   :  { %v241_v54 = vpop.permute.xlu1 %240 }
 0x235   :  { %v258_v55 = vadd.f32 %v241_v54, %v234_v53 }
 0x237   :  { %v262_v57 = vmax.f32 %v258_v55, 0.0 }
 0x238   :  { %v251_v58 = vpop.permute.xlu1 %250 }
 0x239   :  { %266 = vst.msk [vmem:[%s538_s4] sm:$0xff] %vm141_vm1, %v262_v57  ;;  %v260_v59 = vadd.f32 %v251_v58, %v236_v56 }
 0x23b   :  { %v264_v61 = vmax.f32 %v260_v59, 0.0 }
 0x23c   :  { %v246_v62 = vpop.permute.xlu1 %245 }
 0x23d   :  { %268 = vst.msk [vmem:[%s538_s4 + $0x10] sm:$0xff] %vm141_vm1, %v264_v61  ;;  %v259_v36 = vadd.f32 %v246_v62, %v235_v60 }
 0x23f   :  { %v263_v63 = vmax.f32 %v259_v36, 0.0 }
 0x240   :  { %v256_v0 = vpop.permute.xlu1 %255 }
 0x241   :  { %267 = vst.msk [vmem:[%s538_s4 + $0x8] sm:$0xff] %vm141_vm1, %v263_v63  ;;  %v261_v1 = vadd.f32 %v256_v0, %v237_v37 }
 0x243   :  { %v265_v2 = vmax.f32 %v261_v1, 0.0 }
 0x245   :  { %269 = vst.msk [vmem:[%s538_s4 + $0x18] sm:$0xff] %vm141_vm1, %v265_v2 }

// kernel: backbone_forward_pallas.30
= control target key start
LH: loop header
LB: loop body
LE: loop exit
PB: predicated region body
PF: predicated region fallthrough
CT: control target
= control target key end

     0   :  { %vm65_vm0 = vcmask 261120   ;;  %vm248_vm1 = vcmask 64512   ;;  %s748_s0 = inlined_call_operand.vmem [shape: f32[288,8], index: 0, kind: input, shape index: {}]   ;;  %s749_s1 = inlined_call_operand.vmem [shape: f32[32,288], index: 1, kind: input, shape index: {}]   ;;  %s750_s2 = inlined_call_operand.vmem [shape: f32[32,1], index: 2, kind: input, shape index: {}]   ;;  %s751_s3 = inlined_call_operand.vmem [shape: f32[32,1], index: 3, kind: input, shape index: {}]   ;;  %s752_s4 = inlined_call_operand.vmem [shape: f32[32,8], index: 4, kind: output, shape index: {}]  }
   0x1   :  { %v45_v0 = vld [vmem:[%s748_s0 + $0x80] sm:$0xff]  ;;  %v46_v1 = vld [vmem:[%s748_s0 + $0x88] sm:$0xff]  ;;  %v47_v5 = vld [vmem:[%s748_s0 + $0x90] sm:$0xff] }
   0x2   :  { %v29_v2 = vld [vmem:[%s748_s0] sm:$0xff]  ;;  %v451_v3 = vpack.c.bf16 %v46_v1, %v45_v0  ;;  %v30_v4 = vld [vmem:[%s748_s0 + $0x8] sm:$0xff]  ;;  %v48_v6 = vld [vmem:[%s748_s0 + $0x98] sm:$0xff] }
   0x3   :  { %v453_v7 = vpack.c.bf16 %v30_v4, %v29_v2  ;;  %v455_v8 = vpack.c.bf16 %v48_v6, %v47_v5  ;;  %v31_v9 = vld [vmem:[%s748_s0 + $0x10] sm:$0xff]  ;;  %v32_v10 = vld [vmem:[%s748_s0 + $0x18] sm:$0xff]  ;;  %v49_v11 = vld [vmem:[%s748_s0 + $0xa0] sm:$0xff] }
   0x4   :  { %452 = vmatprep.subr.bf16.mxu0 %v451_v3  ;;  %v50_v12 = vld [vmem:[%s748_s0 + $0xa8] sm:$0xff]  ;;  %v457_v13 = vpack.c.bf16 %v32_v10, %v31_v9  ;;  %v33_v15 = vld [vmem:[%s748_s0 + $0x20] sm:$0xff]  ;;  %v51_v17 = vld [vmem:[%s748_s0 + $0xb0] sm:$0xff] }
   0x5   :  { %454 = vmatpush3.bf16.msra.mxu0 %v453_v7  ;;  %v459_v14 = vpack.c.bf16 %v50_v12, %v49_v11  ;;  %v34_v16 = vld [vmem:[%s748_s0 + $0x28] sm:$0xff]  ;;  %v52_v18 = vld [vmem:[%s748_s0 + $0xb8] sm:$0xff]  ;;  %v35_v20 = vld [vmem:[%s748_s0 + $0x30] sm:$0xff] }
   0x6   :  { %456 = vmatprep.subr.bf16.mxu0 %v455_v8  ;;  %v461_v19 = vpack.c.bf16 %v34_v16, %v33_v15  ;;  %v463_v21 = vpack.c.bf16 %v52_v18, %v51_v17  ;;  %v36_v22 = vld [vmem:[%s748_s0 + $0x38] sm:$0xff]  ;;  %v61_v23 = vld [vmem:[%s748_s0 + $0x100] sm:$0xff]  ;;  %v62_v24 = vld [vmem:[%s748_s0 + $0x108] sm:$0xff] }
   0x7   :  { %v53_v25 = vld [vmem:[%s748_s0 + $0xc0] sm:$0xff]  ;;  %v54_v26 = vld [vmem:[%s748_s0 + $0xc8] sm:$0xff]  ;;  %v483_v27 = vpack.c.bf16 %v62_v24, %v61_v23  ;;  %v63_v28 = vld [vmem:[%s748_s0 + $0x110] sm:$0xff]  ;;  %v465_v30 = vpack.c.bf16 %v36_v22, %v35_v20 }
   0x8   :  { %v64_v29 = vld [vmem:[%s748_s0 + $0x118] sm:$0xff]  ;;  %v18_v32 = vld [vmem:[%s749_s1 + $0x8] sm:$0xff]  ;;  %v19_v33 = vld [vmem:[%s749_s1 + $0x10] sm:$0xff]  ;;  %v467_v34 = vpack.c.bf16 %v54_v26, %v53_v25 }
   0x9   :  { %458 = vmatpush3.bf16.msra.mxu0 %v457_v13  ;;  %484 = vmatprep.subr.bf16.mxu1 %v483_v27  ;;  %v487_v31 = vpack.c.bf16 %v64_v29, %v63_v28  ;;  %v37_v35 = vld [vmem:[%s748_s0 + $0x40] sm:$0xff]  ;;  %v38_v36 = vld [vmem:[%s748_s0 + $0x48] sm:$0xff]  ;;  %v55_v37 = vld [vmem:[%s748_s0 + $0xd0] sm:$0xff] }
   0xa   :  { %460 = vmatprep.subr.bf16.mxu0 %v459_v14  ;;  %486 = vmatpush3.bf16.msra.mxu1 %v483_v27  ;;  %v56_v38 = vld [vmem:[%s748_s0 + $0xd8] sm:$0xff]  ;;  %v469_v39 = vpack.c.bf16 %v38_v36, %v37_v35  ;;  %v39_v41 = vld [vmem:[%s748_s0 + $0x50] sm:$0xff]  ;;  %v22_v43 = vld [vmem:[%s749_s1 + $0x28] sm:$0xff] }
   0xb   :  { %488 = vmatprep.subr.bf16.mxu1 %v487_v31  ;;  %142 = vmatprep.mubr.f32.mxu0 %v18_v32  ;;  %v471_v40 = vpack.c.bf16 %v56_v38, %v55_v37  ;;  %v40_v42 = vld [vmem:[%s748_s0 + $0x58] sm:$0xff]  ;;  %v57_v44 = vld [vmem:[%s748_s0 + $0xe0] sm:$0xff]  ;;  %v58_v45 = vld [vmem:[%s748_s0 + $0xe8] sm:$0xff] }
   0xc   :  { %445 = vmatprep.mubr.msk.f32.mxu1 %vm65_vm0, %v19_v33  ;;  %v25_v46 = vld [vmem:[%s749_s1 + $0x40] sm:$0xff]  ;;  %v473_v47 = vpack.c.bf16 %v40_v42, %v39_v41  ;;  %v475_v48 = vpack.c.bf16 %v58_v45, %v57_v44  ;;  %v42_v50 = vld [vmem:[%s748_s0 + $0x68] sm:$0xff]  ;;  %v28_v51 = vld [vmem:[%s749_s1 + $0x58] sm:$0xff] }
   0xd   :  { %462 = vmatpush3.bf16.msra.mxu0 %v461_v19  ;;  %v41_v49 = vld [vmem:[%s748_s0 + $0x60] sm:$0xff]  ;;  %v59_v52 = vld [vmem:[%s748_s0 + $0xf0] sm:$0xff]  ;;  %v60_v53 = vld [vmem:[%s748_s0 + $0xf8] sm:$0xff] }
   0xe   :  { %464 = vmatprep.subr.bf16.mxu0 %v463_v21  ;;  %490 = vmatpush3.bf16.msra.mxu1 %v487_v31  ;;  %v477_v54 = vpack.c.bf16 %v42_v50, %v41_v49  ;;  %v479_v55 = vpack.c.bf16 %v60_v53, %v59_v52  ;;  %v43_v56 = vld [vmem:[%s748_s0 + $0x70] sm:$0xff]  ;;  %v44_v57 = vld [vmem:[%s748_s0 + $0x78] sm:$0xff]  ;;  %v17_v59 = vld [vmem:[%s749_s1] sm:$0xff] }
   0xf   :  { %v481_v58 = vpack.c.bf16 %v44_v57, %v43_v56  ;;  %v21_v60 = vld [vmem:[%s749_s1 + $0x20] sm:$0xff]  ;;  %v20_v61 = vld [vmem:[%s749_s1 + $0x18] sm:$0xff]  ;;  %v23_v63 = vld [vmem:[%s749_s1 + $0x30] sm:$0xff] }
  0x10   :  { %v24_v62 = vld [vmem:[%s749_s1 + $0x38] sm:$0xff]  ;;  %v27_v0 = vld [vmem:[%s749_s1 + $0x50] sm:$0xff]  ;;  %v26_v1 = vld [vmem:[%s749_s1 + $0x48] sm:$0xff] }
  0x11   :  { %466 = vmatpush3.bf16.msra.mxu0 %v465_v30  ;;  %446 = vmatmul.mubr.msk.f32.vlgmr.msra.gmra.mrb[0].mxu1 %vm65_vm0, %v22_v43 }
  0x12   :  { %468 = vmatprep.subr.bf16.mxu0 %v467_v34  ;;  %448 = vmatprep.mubr.msk.f32.mxu1 %vm65_vm0, %v25_v46  ;;  %v502_v34 = vmov 0  }
  0x13   :  { %492 = vset.pattern.permute.xlu0 %v502_v34  ;;  %493 = vset.pattern.permute.xlu1 %v502_v34 }
  0x15   :  { %470 = vmatpush3.bf16.msra.mxu0 %v469_v39  ;;  %449 = vmatmul.mubr.msk.f32.gmra.mrb[2].mxu1 %vm65_vm0, %v28_v51 }
  0x16   :  { %472 = vmatprep.subr.bf16.mxu0 %v471_v40 }
  0x19   :  { %474 = vmatpush3.bf16.msra.mxu0 %v473_v47 }
  0x1a   :  { %476 = vmatprep.subr.bf16.mxu0 %v475_v48 }
  0x1d   :  { %478 = vmatpush3.bf16.msra.mxu0 %v477_v54 }
  0x1e   :  { %480 = vmatprep.subr.bf16.mxu0 %v479_v55 }
  0x21   :  { %482 = vmatpush3.bf16.msra.mxu0 %v481_v58 }
  0x24   :  { %143 = vmatmul.mubr.f32.vlgmr.msra.gmra.mrb[0].mxu0 %v17_v59 }
  0x25   :  { %147 = vmatprep.mubr.f32.mxu0 %v21_v60 }
  0x28   :  { %148 = vmatmul.mubr.f32.gmra.mrb[2].mxu0 %v20_v61  ;;  %v293_v61 = vld [vmem:[%s750_s2] sm:$0xff] }
  0x29   :  { %152 = vmatprep.mubr.f32.mxu0 %v24_v62 }
  0x2c   :  { %153 = vmatmul.mubr.f32.gmra.mrb[4].mxu0 %v23_v63 }
  0x2d   :  { %157 = vmatprep.mubr.f32.mxu0 %v27_v0 }
  0x30   :  { %158 = vmatmul.mubr.f32.gmra.mrb[6].mxu0 %v26_v1  ;;  %v294_v1 = vld [vmem:[%s750_s2 + $0x8] sm:$0xff] }
  0xe4   :  { %v447_v2 = vpop.f32.mrb[0].mxu1 }
  0xe5   :  { %v229_v3 = vpop.f32.mrb[1].mxu1 }
  0xe8   :  { %v450_v4 = vpop.f32.mrb[2].mxu1 }
  0xe9   :  { %v239_v5 = vpop.f32.mrb[3].mxu1 }
  0xf7   :  { %v417_v6 = vpop.f32.mrb[0].mxu0 }
  0xf8   :  { %v418_v7 = vpop.f32.mrb[1].mxu0 }
  0xf9   :  { %v419_v8 = vadd.f32 %v418_v7, %v417_v6  ;;  %v309_v6 = vld [vmem:[%s751_s3] sm:$0xff] }
  0xfb   :  { %v676_v9 = vadd.f32 %v419_v8, %v229_v3  ;;  %v420_v10 = vpop.f32.mrb[2].mxu0 }
  0xfc   :  { %v421_v11 = vpop.f32.mrb[3].mxu0 }
  0xfd   :  { %v422_v12 = vadd.f32 %v421_v11, %v420_v10  ;;  %v249_v13 = vsel %vm248_vm1, %v676_v9, 0.0  ;;  %v265_v14 = vmul.f32 %v676_v9, %v676_v9  ;;  %v295_v10 = vld [vmem:[%s750_s2 + $0x10] sm:$0xff] }
  0xfe   :  { %250 = vadd.xlane.f32.xlu0 %v249_v13  ;;  %v310_v13 = vld [vmem:[%s751_s3 + $0x8] sm:$0xff] }
  0xff   :  { %v682_v15 = vadd.f32 %v447_v2, %v422_v12  ;;  %v423_v16 = vpop.f32.mrb[4].mxu0  ;;  %v269_v19 = vsel %vm248_vm1, %v265_v14, 0.0 }
 0x100   :  { %v424_v17 = vpop.f32.mrb[5].mxu0 }
 0x101   :  { %v425_v18 = vadd.f32 %v424_v17, %v423_v16  ;;  %v266_v20 = vmul.f32 %v682_v15, %v682_v15  ;;  %v252_v26 = vsel %vm248_vm1, %v682_v15, 0.0  ;;  %v296_v17 = vld [vmem:[%s750_s2 + $0x18] sm:$0xff] }
 0x102   :  { %270 = vadd.xlane.f32.xlu0 %v269_v19 }
 0x103   :  { %v687_v21 = vadd.f32 %v425_v18, %v239_v5  ;;  %v272_v22 = vsel %vm248_vm1, %v266_v20, 0.0  ;;  %v426_v23 = vpop.f32.mrb[6].mxu0  ;;  %v311_v20 = vld [vmem:[%s751_s3 + $0x10] sm:$0xff] }
 0x104   :  { %273 = vadd.xlane.f32.xlu1 %v272_v22  ;;  %v427_v24 = vpop.f32.mrb[7].mxu0 }
 0x105   :  { %v428_v25 = vadd.f32 %v427_v24, %v426_v23  ;;  %v255_v27 = vsel %vm248_vm1, %v687_v21, 0.0  ;;  %v267_v28 = vmul.f32 %v687_v21, %v687_v21  ;;  %v312_v24 = vld [vmem:[%s751_s3 + $0x18] sm:$0xff] }
 0x106   :  { %253 = vadd.xlane.f32.xlu0 %v252_v26 }
 0x107   :  { %v696_v29 = vadd.f32 %v450_v4, %v428_v25  ;;  %v275_v30 = vsel %vm248_vm1, %v267_v28, 0.0 }
 0x108   :  { %256 = vadd.xlane.f32.xlu1 %v255_v27 }
 0x109   :  { %v258_v31 = vsel %vm248_vm1, %v696_v29, 0.0  ;;  %v268_v32 = vmul.f32 %v696_v29, %v696_v29 }
 0x10a   :  { %276 = vadd.xlane.f32.xlu0 %v275_v30 }
 0x10b   :  { %v278_v33 = vsel %vm248_vm1, %v268_v32, 0.0 }
 0x10c   :  { %259 = vadd.xlane.f32.xlu1 %v258_v31 }
 0x110   :  { %279 = vadd.xlane.f32.xlu1 %v278_v33 }
 0x18b   :  { %v251_v35 = vpop.xlane.xlu0 %250 }
 0x18c   :  { %v261_v36 = vmul.f32 0.125, %v251_v35 }
 0x18e   :  { %v285_v38 = vmul.f32 %v261_v36, %v261_v36 }
 0x18f   :  { %v271_v37 = vpop.xlane.xlu0 %270 }
 0x190   :  { %v281_v39 = vmul.f32 0.125, %v271_v37 }
 0x191   :  { %v274_v40 = vpop.xlane.xlu1 %273 }
 0x192   :  { %v289_v41 = vsub.f32 %v281_v39, %v285_v38  ;;  %v282_v46 = vmul.f32 0.125, %v274_v40 }
 0x193   :  { %v254_v42 = vpop.xlane.xlu0 %253 }
 0x194   :  { %v297_v43 = vadd.f32 1e-05, %v289_v41  ;;  %v262_v44 = vmul.f32 0.125, %v254_v42 }
 0x195   :  { %v257_v45 = vpop.xlane.xlu1 %256 }
 0x196   :  { %494 = vrsqrt.f32 %v297_v43  ;;  %v286_v47 = vmul.f32 %v262_v44, %v262_v44  ;;  %v263_v48 = vmul.f32 0.125, %v257_v45 }
 0x197   :  { %v277_v49 = vpop.xlane.xlu0 %276 }
 0x198   :  { %v290_v50 = vsub.f32 %v282_v46, %v286_v47  ;;  %v287_v51 = vmul.f32 %v263_v48, %v263_v48  ;;  %v283_v52 = vmul.f32 0.125, %v277_v49 }
 0x199   :  { %v260_v53 = vpop.xlane.xlu1 %259 }
 0x19a   :  { %v298_v54 = vadd.f32 1e-05, %v290_v50  ;;  %v291_v55 = vsub.f32 %v283_v52, %v287_v51  ;;  %v264_v56 = vmul.f32 0.125, %v260_v53 }
 0x19c   :  { %496 = vrsqrt.f32 %v298_v54  ;;  %v299_v58 = vadd.f32 1e-05, %v291_v55  ;;  %v288_v59 = vmul.f32 %v264_v56, %v264_v56 }
 0x19d   :  { %v280_v57 = vpop.xlane.xlu1 %279 }
 0x19e   :  { %v284_v60 = vmul.f32 0.125, %v280_v57  ;;  %498 = vrsqrt.f32 %v299_v58 }
 0x1a0   :  { %v495_v62 = vpop.eup %494  ;;  %v292_v0 = vsub.f32 %v284_v60, %v288_v59 }
 0x1a1   :  { %v305_v63 = vmul.f32 %v495_v62, %v293_v61 }
 0x1a2   :  { %v300_v3 = vadd.f32 1e-05, %v292_v0 }
 0x1a3   :  { %323 = vperm.xlu0 %492, %v305_v63   ;;  %v313_v5 = vmul.f32 %v305_v63, %v261_v36 }
 0x1a4   :  { %500 = vrsqrt.f32 %v300_v3 }
 0x1a5   :  { %v317_v7 = vsub.f32 %v309_v6, %v313_v5 }
 0x1a6   :  { %v497_v2 = vpop.eup %496 }
 0x1a7   :  { %v306_v4 = vmul.f32 %v497_v2, %v294_v1 }
 0x1a8   :  { %v499_v8 = vpop.eup %498 }
 0x1a9   :  { %328 = vperm.xlu1 %493, %v306_v4   ;;  %v314_v11 = vmul.f32 %v306_v4, %v262_v44  ;;  %v307_v12 = vmul.f32 %v499_v8, %v295_v10 }
 0x1ab   :  { %v318_v14 = vsub.f32 %v310_v13, %v314_v11  ;;  %v315_v19 = vmul.f32 %v307_v12, %v263_v48 }
 0x1ad   :  { %347 = vperm.xlu1 %493, %v317_v7   ;;  %v319_v22 = vsub.f32 %v311_v20, %v315_v19 }
 0x1ae   :  { %v501_v16 = vpop.eup %500 }
 0x1af   :  { %v308_v18 = vmul.f32 %v501_v16, %v296_v17 }
 0x1b1   :  { %333 = vperm.xlu1 %493, %v307_v12   ;;  %v316_v23 = vmul.f32 %v308_v18, %v264_v56 }
 0x1b3   :  { %v320_v25 = vsub.f32 %v312_v24, %v316_v23 }
 0x1b5   :  { %352 = vperm.xlu1 %493, %v318_v14  }
 0x1b9   :  { %338 = vperm.xlu1 %493, %v308_v18  }
 0x1bd   :  { %357 = vperm.xlu1 %493, %v319_v22  }
 0x1c1   :  { %362 = vperm.xlu1 %493, %v320_v25  }
 0x222   :  { %v324_v26 = vpop.permute.xlu0 %323 }
 0x223   :  { %v341_v28 = vmul.f32 %v324_v26, %v676_v9 }
 0x228   :  { %v329_v27 = vpop.permute.xlu1 %328 }
 0x229   :  { %v342_v34 = vmul.f32 %v329_v27, %v682_v15 }
 0x22c   :  { %v348_v30 = vpop.permute.xlu1 %347 }
 0x22d   :  { %v365_v31 = vadd.f32 %v348_v30, %v341_v28 }
 0x22f   :  { %v369_v32 = vmax.f32 %v365_v31, 0.0 }
 0x230   :  { %v334_v33 = vpop.permute.xlu1 %333 }
 0x231   :  { %373 = vst.msk [vmem:[%s752_s4] sm:$0xff] %vm248_vm1, %v369_v32  ;;  %v343_v9 = vmul.f32 %v334_v33, %v687_v21 }
 0x234   :  { %v353_v35 = vpop.permute.xlu1 %352 }
 0x235   :  { %v366_v36 = vadd.f32 %v353_v35, %v342_v34 }
 0x237   :  { %v370_v37 = vmax.f32 %v366_v36, 0.0 }
 0x238   :  { %v339_v38 = vpop.permute.xlu1 %338 }
 0x239   :  { %374 = vst.msk [vmem:[%s752_s4 + $0x8] sm:$0xff] %vm248_vm1, %v370_v37  ;;  %v344_v41 = vmul.f32 %v339_v38, %v696_v29 }
 0x23c   :  { %v358_v39 = vpop.permute.xlu1 %357 }
 0x23d   :  { %v367_v40 = vadd.f32 %v358_v39, %v343_v9 }
 0x23f   :  { %v371_v42 = vmax.f32 %v367_v40, 0.0 }
 0x240   :  { %v363_v43 = vpop.permute.xlu1 %362 }
 0x241   :  { %375 = vst.msk [vmem:[%s752_s4 + $0x10] sm:$0xff] %vm248_vm1, %v371_v42  ;;  %v368_v15 = vadd.f32 %v363_v43, %v344_v41 }
 0x243   :  { %v372_v44 = vmax.f32 %v368_v15, 0.0 }
 0x245   :  { %376 = vst.msk [vmem:[%s752_s4 + $0x18] sm:$0xff] %vm248_vm1, %v372_v44 }

// kernel: backbone_forward_pallas.37
= control target key start
LH: loop header
LB: loop body
LE: loop exit
PB: predicated region body
PF: predicated region fallthrough
CT: control target
= control target key end

     0   :  { %vm59_vm0 = vcmask 261120   ;;  %s556_s0 = inlined_call_operand.vmem [shape: f32[288,128], index: 0, kind: input, shape index: {}]   ;;  %s557_s1 = inlined_call_operand.vmem [shape: f32[16,288], index: 1, kind: input, shape index: {}]   ;;  %s558_s2 = inlined_call_operand.vmem [shape: f32[16,1], index: 2, kind: input, shape index: {}]   ;;  %s559_s3 = inlined_call_operand.vmem [shape: f32[16,1], index: 3, kind: input, shape index: {}]   ;;  %s560_s4 = inlined_call_operand.vmem [shape: f32[16,128], index: 4, kind: output, shape index: {}]  }
   0x1   :  { %v39_v0 = vld [vmem:[%s556_s0 + $0x80] sm:$0xff]  ;;  %v40_v1 = vld [vmem:[%s556_s0 + $0x88] sm:$0xff]  ;;  %v41_v5 = vld [vmem:[%s556_s0 + $0x90] sm:$0xff] }
   0x2   :  { %v23_v2 = vld [vmem:[%s556_s0] sm:$0xff]  ;;  %v337_v3 = vpack.c.bf16 %v40_v1, %v39_v0  ;;  %v24_v4 = vld [vmem:[%s556_s0 + $0x8] sm:$0xff]  ;;  %v42_v6 = vld [vmem:[%s556_s0 + $0x98] sm:$0xff] }
   0x3   :  { %v339_v7 = vpack.c.bf16 %v24_v4, %v23_v2  ;;  %v341_v8 = vpack.c.bf16 %v42_v6, %v41_v5  ;;  %v25_v9 = vld [vmem:[%s556_s0 + $0x10] sm:$0xff]  ;;  %v26_v10 = vld [vmem:[%s556_s0 + $0x18] sm:$0xff]  ;;  %v43_v11 = vld [vmem:[%s556_s0 + $0xa0] sm:$0xff] }
   0x4   :  { %338 = vmatprep.subr.bf16.mxu0 %v337_v3  ;;  %v44_v12 = vld [vmem:[%s556_s0 + $0xa8] sm:$0xff]  ;;  %v343_v13 = vpack.c.bf16 %v26_v10, %v25_v9  ;;  %v27_v15 = vld [vmem:[%s556_s0 + $0x20] sm:$0xff]  ;;  %v45_v17 = vld [vmem:[%s556_s0 + $0xb0] sm:$0xff] }
   0x5   :  { %340 = vmatpush3.bf16.msra.mxu0 %v339_v7  ;;  %v345_v14 = vpack.c.bf16 %v44_v12, %v43_v11  ;;  %v28_v16 = vld [vmem:[%s556_s0 + $0x28] sm:$0xff]  ;;  %v46_v18 = vld [vmem:[%s556_s0 + $0xb8] sm:$0xff]  ;;  %v29_v20 = vld [vmem:[%s556_s0 + $0x30] sm:$0xff] }
   0x6   :  { %342 = vmatprep.subr.bf16.mxu0 %v341_v8  ;;  %v347_v19 = vpack.c.bf16 %v28_v16, %v27_v15  ;;  %v349_v21 = vpack.c.bf16 %v46_v18, %v45_v17  ;;  %v30_v22 = vld [vmem:[%s556_s0 + $0x38] sm:$0xff]  ;;  %v55_v23 = vld [vmem:[%s556_s0 + $0x100] sm:$0xff]  ;;  %v56_v24 = vld [vmem:[%s556_s0 + $0x108] sm:$0xff]  ;;  %v384_v8 = vmov 0  }
   0x7   :  { %v47_v25 = vld [vmem:[%s556_s0 + $0xc0] sm:$0xff]  ;;  %v48_v26 = vld [vmem:[%s556_s0 + $0xc8] sm:$0xff]  ;;  %v369_v27 = vpack.c.bf16 %v56_v24, %v55_v23  ;;  %v57_v28 = vld [vmem:[%s556_s0 + $0x110] sm:$0xff]  ;;  %v351_v30 = vpack.c.bf16 %v30_v22, %v29_v20  ;;  %378 = vset.pattern.permute.xlu0 %v384_v8  ;;  %379 = vset.pattern.permute.xlu1 %v384_v8 }
   0x8   :  { %v58_v29 = vld [vmem:[%s556_s0 + $0x118] sm:$0xff]  ;;  %v18_v32 = vld [vmem:[%s557_s1 + $0x8] sm:$0xff]  ;;  %v19_v33 = vld [vmem:[%s557_s1 + $0x10] sm:$0xff]  ;;  %v353_v34 = vpack.c.bf16 %v48_v26, %v47_v25 }
   0x9   :  { %344 = vmatpush3.bf16.msra.mxu0 %v343_v13  ;;  %370 = vmatprep.subr.bf16.mxu1 %v369_v27  ;;  %v373_v31 = vpack.c.bf16 %v58_v29, %v57_v28  ;;  %v31_v35 = vld [vmem:[%s556_s0 + $0x40] sm:$0xff]  ;;  %v32_v36 = vld [vmem:[%s556_s0 + $0x48] sm:$0xff]  ;;  %v49_v37 = vld [vmem:[%s556_s0 + $0xd0] sm:$0xff] }
   0xa   :  { %346 = vmatprep.subr.bf16.mxu0 %v345_v14  ;;  %372 = vmatpush3.bf16.msra.mxu1 %v369_v27  ;;  %v50_v38 = vld [vmem:[%s556_s0 + $0xd8] sm:$0xff]  ;;  %v355_v39 = vpack.c.bf16 %v32_v36, %v31_v35  ;;  %v33_v41 = vld [vmem:[%s556_s0 + $0x50] sm:$0xff]  ;;  %v22_v43 = vld [vmem:[%s557_s1 + $0x28] sm:$0xff] }
   0xb   :  { %374 = vmatprep.subr.bf16.mxu1 %v373_v31  ;;  %130 = vmatprep.mubr.f32.mxu0 %v18_v32  ;;  %v357_v40 = vpack.c.bf16 %v50_v38, %v49_v37  ;;  %v34_v42 = vld [vmem:[%s556_s0 + $0x58] sm:$0xff]  ;;  %v51_v44 = vld [vmem:[%s556_s0 + $0xe0] sm:$0xff]  ;;  %v52_v45 = vld [vmem:[%s556_s0 + $0xe8] sm:$0xff] }
   0xc   :  { %334 = vmatprep.mubr.msk.f32.mxu1 %vm59_vm0, %v19_v33  ;;  %v359_v46 = vpack.c.bf16 %v34_v42, %v33_v41  ;;  %v361_v47 = vpack.c.bf16 %v52_v45, %v51_v44  ;;  %v35_v48 = vld [vmem:[%s556_s0 + $0x60] sm:$0xff]  ;;  %v36_v49 = vld [vmem:[%s556_s0 + $0x68] sm:$0xff]  ;;  %v53_v50 = vld [vmem:[%s556_s0 + $0xf0] sm:$0xff] }
   0xd   :  { %348 = vmatpush3.bf16.msra.mxu0 %v347_v19  ;;  %v54_v51 = vld [vmem:[%s556_s0 + $0xf8] sm:$0xff]  ;;  %v363_v52 = vpack.c.bf16 %v36_v49, %v35_v48  ;;  %v37_v54 = vld [vmem:[%s556_s0 + $0x70] sm:$0xff]  ;;  %v17_v57 = vld [vmem:[%s557_s1] sm:$0xff] }
   0xe   :  { %350 = vmatprep.subr.bf16.mxu0 %v349_v21  ;;  %376 = vmatpush3.bf16.msra.mxu1 %v373_v31  ;;  %v365_v53 = vpack.c.bf16 %v54_v51, %v53_v50  ;;  %v38_v55 = vld [vmem:[%s556_s0 + $0x78] sm:$0xff]  ;;  %v21_v58 = vld [vmem:[%s557_s1 + $0x20] sm:$0xff]  ;;  %v235_v26 = vld [vmem:[%s558_s2 + $0x8] sm:$0xff] }
   0xf   :  { %v367_v56 = vpack.c.bf16 %v38_v55, %v37_v54  ;;  %v20_v59 = vld [vmem:[%s557_s1 + $0x18] sm:$0xff]  ;;  %v234_v23 = vld [vmem:[%s558_s2] sm:$0xff]  ;;  %v243_v33 = vld [vmem:[%s559_s3 + $0x8] sm:$0xff] }
  0x11   :  { %352 = vmatpush3.bf16.msra.mxu0 %v351_v30  ;;  %335 = vmatmul.mubr.msk.f32.vlgmr.msra.gmra.mrb[0].mxu1 %vm59_vm0, %v22_v43  ;;  %v242_v30 = vld [vmem:[%s559_s3] sm:$0xff] }
  0x12   :  { %354 = vmatprep.subr.bf16.mxu0 %v353_v34 }
  0x15   :  { %356 = vmatpush3.bf16.msra.mxu0 %v355_v39 }
  0x16   :  { %358 = vmatprep.subr.bf16.mxu0 %v357_v40 }
  0x19   :  { %360 = vmatpush3.bf16.msra.mxu0 %v359_v46 }
  0x1a   :  { %362 = vmatprep.subr.bf16.mxu0 %v361_v47 }
  0x1d   :  { %364 = vmatpush3.bf16.msra.mxu0 %v363_v52 }
  0x1e   :  { %366 = vmatprep.subr.bf16.mxu0 %v365_v53 }
  0x21   :  { %368 = vmatpush3.bf16.msra.mxu0 %v367_v56 }
  0x24   :  { %131 = vmatmul.mubr.f32.vlgmr.msra.gmra.mrb[0].mxu0 %v17_v57 }
  0x25   :  { %135 = vmatprep.mubr.f32.mxu0 %v21_v58 }
  0x28   :  { %136 = vmatmul.mubr.f32.gmra.mrb[2].mxu0 %v20_v59 }
  0xe4   :  { %v336_v60 = vpop.f32.mrb[0].mxu1 }
  0xe5   :  { %v207_v61 = vpop.f32.mrb[1].mxu1 }
  0xf7   :  { %v314_v62 = vpop.f32.mrb[0].mxu0 }
  0xf8   :  { %v315_v63 = vpop.f32.mrb[1].mxu0 }
  0xf9   :  { %v316_v0 = vadd.f32 %v315_v63, %v314_v62 }
  0xfb   :  { %v208_v1 = vadd.f32 %v316_v0, %v207_v61  ;;  %v317_v2 = vpop.f32.mrb[2].mxu0 }
  0xfc   :  { %v318_v3 = vpop.f32.mrb[3].mxu0 }
  0xfd   :  { %v319_v4 = vadd.f32 %v318_v3, %v317_v2  ;;  %216 = vadd.xlane.f32.xlu0 %v208_v1  ;;  %v222_v5 = vmul.f32 %v208_v1, %v208_v1 }
  0xff   :  { %v213_v6 = vadd.f32 %v336_v60, %v319_v4  ;;  %224 = vadd.xlane.f32.xlu1 %v222_v5 }
 0x101   :  { %218 = vadd.xlane.f32.xlu0 %v213_v6  ;;  %v223_v7 = vmul.f32 %v213_v6, %v213_v6 }
 0x103   :  { %226 = vadd.xlane.f32.xlu1 %v223_v7 }
 0x18a   :  { %v217_v9 = vpop.xlane.xlu0 %216 }
 0x18b   :  { %v220_v10 = vmul.f32 0.0078125, %v217_v9 }
 0x18c   :  { %v225_v11 = vpop.xlane.xlu1 %224 }
 0x18d   :  { %v230_v12 = vmul.f32 %v220_v10, %v220_v10  ;;  %v228_v13 = vmul.f32 0.0078125, %v225_v11 }
 0x18e   :  { %v219_v14 = vpop.xlane.xlu0 %218 }
 0x18f   :  { %v232_v15 = vsub.f32 %v228_v13, %v230_v12  ;;  %v221_v16 = vmul.f32 0.0078125, %v219_v14 }
 0x190   :  { %v227_v17 = vpop.xlane.xlu1 %226 }
 0x191   :  { %v236_v18 = vadd.f32 1e-05, %v232_v15  ;;  %v231_v19 = vmul.f32 %v221_v16, %v221_v16  ;;  %v229_v20 = vmul.f32 0.0078125, %v227_v17 }
 0x193   :  { %380 = vrsqrt.f32 %v236_v18  ;;  %v233_v21 = vsub.f32 %v229_v20, %v231_v19 }
 0x195   :  { %v237_v22 = vadd.f32 1e-05, %v233_v21 }
 0x197   :  { %382 = vrsqrt.f32 %v237_v22 }
 0x19d   :  { %v381_v24 = vpop.eup %380 }
 0x19e   :  { %v240_v25 = vmul.f32 %v381_v24, %v234_v23 }
 0x1a0   :  { %250 = vperm.xlu0 %378, %v240_v25   ;;  %v244_v29 = vmul.f32 %v240_v25, %v220_v10 }
 0x1a1   :  { %v383_v27 = vpop.eup %382 }
 0x1a2   :  { %v241_v28 = vmul.f32 %v383_v27, %v235_v26  ;;  %v246_v31 = vsub.f32 %v242_v30, %v244_v29 }
 0x1a4   :  { %255 = vperm.xlu1 %379, %v241_v28   ;;  %v245_v32 = vmul.f32 %v241_v28, %v221_v16 }
 0x1a6   :  { %v247_v34 = vsub.f32 %v243_v33, %v245_v32 }
 0x1a8   :  { %262 = vperm.xlu1 %379, %v246_v31  }
 0x1ac   :  { %267 = vperm.xlu1 %379, %v247_v34  }
 0x21f   :  { %v251_v35 = vpop.permute.xlu0 %250 }
 0x220   :  { %v258_v37 = vmul.f32 %v251_v35, %v208_v1 }
 0x223   :  { %v256_v36 = vpop.permute.xlu1 %255 }
 0x224   :  { %v259_v40 = vmul.f32 %v256_v36, %v213_v6 }
 0x227   :  { %v263_v38 = vpop.permute.xlu1 %262 }
 0x228   :  { %v270_v39 = vadd.f32 %v263_v38, %v258_v37 }
 0x22a   :  { %v272_v41 = vmax.f32 %v270_v39, 0.0 }
 0x22b   :  { %v268_v42 = vpop.permute.xlu1 %267 }
 0x22c   :  { %274 = vst [vmem:[%s560_s4] sm:$0xff] %v272_v41  ;;  %v271_v43 = vadd.f32 %v268_v42, %v259_v40 }
 0x22e   :  { %v273_v44 = vmax.f32 %v271_v43, 0.0 }
 0x230   :  { %275 = vst [vmem:[%s560_s4 + $0x8] sm:$0xff] %v273_v44 }

// kernel: backbone_forward_pallas.36
= control target key start
LH: loop header
LB: loop body
LE: loop exit
PB: predicated region body
PF: predicated region fallthrough
CT: control target
= control target key end

     0   :  { %v240_v0 = vmov 0.0|0.0   ;;  %vm39_vm0 = vcmask 130048   ;;  %v241_v38 = vmov 0   ;;  %s369_s0 = inlined_call_operand.vmem [shape: f32[144,128], index: 0, kind: input, shape index: {}]   ;;  %s370_s1 = inlined_call_operand.vmem [shape: f32[16,144], index: 1, kind: input, shape index: {}]   ;;  %s371_s2 = inlined_call_operand.vmem [shape: f32[16,1], index: 2, kind: input, shape index: {}]   ;;  %s372_s3 = inlined_call_operand.vmem [shape: f32[16,1], index: 3, kind: input, shape index: {}]   ;;  %s373_s4 = inlined_call_operand.vmem [shape: f32[16,128], index: 4, kind: output, shape index: {}]  }
   0x1   :  { %187 = vmatprep.subr.bf16.mxu0 %v240_v0  ;;  %v21_v1 = vld [vmem:[%s369_s0] sm:$0xff]  ;;  %v22_v2 = vld [vmem:[%s369_s0 + $0x8] sm:$0xff]  ;;  %214 = vmatprep.subr.bf16.mxu1 %v240_v0  ;;  %v23_v3 = vld [vmem:[%s369_s0 + $0x10] sm:$0xff] }
   0x2   :  { %v188_v4 = vpack.c.bf16 %v22_v2, %v21_v1  ;;  %v24_v5 = vld [vmem:[%s369_s0 + $0x18] sm:$0xff]  ;;  %v25_v7 = vld [vmem:[%s369_s0 + $0x20] sm:$0xff]  ;;  %v26_v8 = vld [vmem:[%s369_s0 + $0x28] sm:$0xff]  ;;  %234 = vset.pattern.permute.xlu0 %v241_v38  ;;  %235 = vset.pattern.permute.xlu1 %v241_v38 }
   0x3   :  { %v191_v6 = vpack.c.bf16 %v24_v5, %v23_v3  ;;  %v18_v9 = vld [vmem:[%s370_s1 + $0x8] sm:$0xff]  ;;  %v20_v10 = vld [vmem:[%s370_s1 + $0x18] sm:$0xff]  ;;  %v194_v11 = vpack.c.bf16 %v26_v8, %v25_v7  ;;  %v27_v12 = vld [vmem:[%s369_s0 + $0x30] sm:$0xff] }
   0x4   :  { %189 = vmatpush1.bf16.msra.mxu0 %v188_v4  ;;  %223 = vmatpush1.bf16.msra.mxu1 %v188_v4  ;;  %v28_v13 = vld [vmem:[%s369_s0 + $0x38] sm:$0xff]  ;;  %v29_v15 = vld [vmem:[%s369_s0 + $0x40] sm:$0xff]  ;;  %v30_v16 = vld [vmem:[%s369_s0 + $0x48] sm:$0xff] }
   0x5   :  { %190 = vmatprep.subr.bf16.mxu0 %v240_v0  ;;  %215 = vmatprep.subr.bf16.mxu1 %v240_v0  ;;  %v197_v14 = vpack.c.bf16 %v28_v13, %v27_v12  ;;  %v200_v17 = vpack.c.bf16 %v30_v16, %v29_v15  ;;  %v31_v18 = vld [vmem:[%s369_s0 + $0x50] sm:$0xff]  ;;  %v32_v19 = vld [vmem:[%s369_s0 + $0x58] sm:$0xff]  ;;  %v33_v21 = vld [vmem:[%s369_s0 + $0x60] sm:$0xff] }
   0x6   :  { %185 = vmatprep.mubr.msk.f32.mxu0 %vm39_vm0, %v18_v9  ;;  %186 = vmatprep.mubr.msk.f32.mxu1 %vm39_vm0, %v20_v10  ;;  %v203_v20 = vpack.c.bf16 %v32_v19, %v31_v18  ;;  %v34_v22 = vld [vmem:[%s369_s0 + $0x68] sm:$0xff]  ;;  %v35_v24 = vld [vmem:[%s369_s0 + $0x70] sm:$0xff]  ;;  %v36_v25 = vld [vmem:[%s369_s0 + $0x78] sm:$0xff] }
   0x7   :  { %v206_v23 = vpack.c.bf16 %v34_v22, %v33_v21  ;;  %v209_v26 = vpack.c.bf16 %v36_v25, %v35_v24  ;;  %v37_v27 = vld [vmem:[%s369_s0 + $0x80] sm:$0xff]  ;;  %v38_v28 = vld [vmem:[%s369_s0 + $0x88] sm:$0xff]  ;;  %v19_v31 = vld [vmem:[%s370_s1 + $0x10] sm:$0xff] }
   0x8   :  { %192 = vmatpush1.bf16.msra.mxu0 %v191_v6  ;;  %224 = vmatpush1.bf16.msra.mxu1 %v191_v6  ;;  %v212_v29 = vpack.c.bf16 %v38_v28, %v37_v27  ;;  %v17_v30 = vld [vmem:[%s370_s1] sm:$0xff]  ;;  %v140_v56 = vld [vmem:[%s371_s2 + $0x8] sm:$0xff] }
   0x9   :  { %193 = vmatprep.subr.bf16.mxu0 %v240_v0  ;;  %216 = vmatprep.subr.bf16.mxu1 %v240_v0  ;;  %v139_v53 = vld [vmem:[%s371_s2] sm:$0xff]  ;;  %v148_v63 = vld [vmem:[%s372_s3 + $0x8] sm:$0xff] }
   0xa   :  { %v147_v60 = vld [vmem:[%s372_s3] sm:$0xff] }
   0xc   :  { %195 = vmatpush1.bf16.msra.mxu0 %v194_v11  ;;  %225 = vmatpush1.bf16.msra.mxu1 %v194_v11 }
   0xd   :  { %196 = vmatprep.subr.bf16.mxu0 %v240_v0  ;;  %217 = vmatprep.subr.bf16.mxu1 %v240_v0 }
  0x10   :  { %198 = vmatpush1.bf16.msra.mxu0 %v197_v14  ;;  %226 = vmatpush1.bf16.msra.mxu1 %v197_v14 }
  0x11   :  { %199 = vmatprep.subr.bf16.mxu0 %v240_v0  ;;  %218 = vmatprep.subr.bf16.mxu1 %v240_v0 }
  0x14   :  { %201 = vmatpush1.bf16.msra.mxu0 %v200_v17  ;;  %227 = vmatpush1.bf16.msra.mxu1 %v200_v17 }
  0x15   :  { %202 = vmatprep.subr.bf16.mxu0 %v240_v0  ;;  %219 = vmatprep.subr.bf16.mxu1 %v240_v0 }
  0x18   :  { %204 = vmatpush1.bf16.msra.mxu0 %v203_v20  ;;  %228 = vmatpush1.bf16.msra.mxu1 %v203_v20 }
  0x19   :  { %205 = vmatprep.subr.bf16.mxu0 %v240_v0  ;;  %220 = vmatprep.subr.bf16.mxu1 %v240_v0 }
  0x1c   :  { %207 = vmatpush1.bf16.msra.mxu0 %v206_v23  ;;  %229 = vmatpush1.bf16.msra.mxu1 %v206_v23 }
  0x1d   :  { %208 = vmatprep.subr.bf16.mxu0 %v240_v0  ;;  %221 = vmatprep.subr.bf16.mxu1 %v240_v0 }
  0x20   :  { %210 = vmatpush1.bf16.msra.mxu0 %v209_v26  ;;  %230 = vmatpush1.bf16.msra.mxu1 %v209_v26 }
  0x21   :  { %211 = vmatprep.subr.bf16.mxu0 %v240_v0  ;;  %222 = vmatprep.subr.bf16.mxu1 %v240_v0 }
  0x24   :  { %213 = vmatpush1.bf16.msra.mxu0 %v212_v29  ;;  %231 = vmatpush1.bf16.msra.mxu1 %v212_v29 }
  0x27   :  { %111 = vmatmul.mubr.f32.vlgmr.msra.gmra.mrb[0].mxu0 %v17_v30  ;;  %116 = vmatmul.mubr.f32.vlgmr.msra.gmra.mrb[0].mxu1 %v19_v31 }
  0xfa   :  { %v112_v32 = vpop.f32.mrb[0].mxu0  ;;  %v117_v33 = vpop.f32.mrb[0].mxu1 }
  0xfb   :  { %121 = vadd.xlane.f32.xlu0 %v112_v32  ;;  %v114_v34 = vpop.f32.mrb[1].mxu0  ;;  %v127_v35 = vmul.f32 %v112_v32, %v112_v32  ;;  %v119_v36 = vpop.f32.mrb[1].mxu1  ;;  %v128_v37 = vmul.f32 %v117_v33, %v117_v33 }
  0xfd   :  { %129 = vadd.xlane.f32.xlu1 %v127_v35 }
  0xff   :  { %123 = vadd.xlane.f32.xlu0 %v117_v33 }
 0x101   :  { %131 = vadd.xlane.f32.xlu1 %v128_v37 }
 0x188   :  { %v122_v39 = vpop.xlane.xlu0 %121 }
 0x189   :  { %v125_v40 = vmul.f32 0.0078125, %v122_v39 }
 0x18a   :  { %v130_v41 = vpop.xlane.xlu1 %129 }
 0x18b   :  { %v135_v42 = vmul.f32 %v125_v40, %v125_v40  ;;  %v133_v43 = vmul.f32 0.0078125, %v130_v41 }
 0x18c   :  { %v124_v44 = vpop.xlane.xlu0 %123 }
 0x18d   :  { %v137_v45 = vsub.f32 %v133_v43, %v135_v42  ;;  %v126_v46 = vmul.f32 0.0078125, %v124_v44 }
 0x18e   :  { %v132_v47 = vpop.xlane.xlu1 %131 }
 0x18f   :  { %v141_v48 = vadd.f32 1e-05, %v137_v45  ;;  %v136_v49 = vmul.f32 %v126_v46, %v126_v46  ;;  %v134_v50 = vmul.f32 0.0078125, %v132_v47 }
 0x191   :  { %236 = vrsqrt.f32 %v141_v48  ;;  %v138_v51 = vsub.f32 %v134_v50, %v136_v49 }
 0x193   :  { %v142_v52 = vadd.f32 1e-05, %v138_v51 }
 0x195   :  { %238 = vrsqrt.f32 %v142_v52 }
 0x19b   :  { %v237_v54 = vpop.eup %236 }
 0x19c   :  { %v145_v55 = vmul.f32 %v237_v54, %v139_v53 }
 0x19e   :  { %155 = vperm.xlu0 %234, %v145_v55   ;;  %v149_v59 = vmul.f32 %v145_v55, %v125_v40 }
 0x19f   :  { %v239_v57 = vpop.eup %238 }
 0x1a0   :  { %v146_v58 = vmul.f32 %v239_v57, %v140_v56  ;;  %v151_v61 = vsub.f32 %v147_v60, %v149_v59 }
 0x1a2   :  { %160 = vperm.xlu1 %235, %v146_v58   ;;  %v150_v62 = vmul.f32 %v146_v58, %v126_v46 }
 0x1a4   :  { %v152_v0 = vsub.f32 %v148_v63, %v150_v62 }
 0x1a6   :  { %167 = vperm.xlu1 %235, %v151_v61  }
 0x1aa   :  { %172 = vperm.xlu1 %235, %v152_v0  }
 0x21d   :  { %v156_v1 = vpop.permute.xlu0 %155 }
 0x21e   :  { %v163_v3 = vmul.f32 %v156_v1, %v112_v32 }
 0x221   :  { %v161_v2 = vpop.permute.xlu1 %160 }
 0x222   :  { %v164_v6 = vmul.f32 %v161_v2, %v117_v33 }
 0x225   :  { %v168_v4 = vpop.permute.xlu1 %167 }
 0x226   :  { %v175_v5 = vadd.f32 %v168_v4, %v163_v3 }
 0x228   :  { %v177_v7 = vmax.f32 %v175_v5, 0.0 }
 0x229   :  { %v173_v8 = vpop.permute.xlu1 %172 }
 0x22a   :  { %179 = vst [vmem:[%s373_s4] sm:$0xff] %v177_v7  ;;  %v176_v9 = vadd.f32 %v173_v8, %v164_v6 }
 0x22c   :  { %v178_v10 = vmax.f32 %v176_v9, 0.0 }
 0x22e   :  { %180 = vst [vmem:[%s373_s4 + $0x8] sm:$0xff] %v178_v10 }

// kernel: backbone_forward_pallas.35
= control target key start
LH: loop header
LB: loop body
LE: loop exit
PB: predicated region body
PF: predicated region fallthrough
CT: control target
= control target key end

     0   :  { %vm28_vm0 = vcmask 588800   ;;  %v231_v19 = vmov 0   ;;  %s310_s0 = inlined_call_operand.vmem [shape: f32[72,128], index: 0, kind: input, shape index: {}]   ;;  %s311_s1 = inlined_call_operand.vmem [shape: f32[16,72], index: 1, kind: input, shape index: {}]   ;;  %s312_s2 = inlined_call_operand.vmem [shape: f32[16,1], index: 2, kind: input, shape index: {}]   ;;  %s313_s3 = inlined_call_operand.vmem [shape: f32[16,1], index: 3, kind: input, shape index: {}]   ;;  %s314_s4 = inlined_call_operand.vmem [shape: f32[16,128], index: 4, kind: output, shape index: {}]  }
   0x1   :  { %v19_v0 = vld [vmem:[%s310_s0] sm:$0xff]  ;;  %v20_v1 = vld [vmem:[%s310_s0 + $0x8] sm:$0xff]  ;;  %v21_v2 = vld [vmem:[%s310_s0 + $0x10] sm:$0xff]  ;;  %225 = vset.pattern.permute.xlu0 %v231_v19  ;;  %226 = vset.pattern.permute.xlu1 %v231_v19 }
   0x2   :  { %v208_v3 = vpack.c.bf16 %v20_v1, %v19_v0  ;;  %v22_v4 = vld [vmem:[%s310_s0 + $0x18] sm:$0xff]  ;;  %v23_v6 = vld [vmem:[%s310_s0 + $0x20] sm:$0xff]  ;;  %v24_v7 = vld [vmem:[%s310_s0 + $0x28] sm:$0xff] }
   0x3   :  { %v212_v5 = vpack.c.bf16 %v22_v4, %v21_v2  ;;  %v17_v8 = vld [vmem:[%s311_s1] sm:$0xff]  ;;  %v216_v9 = vpack.c.bf16 %v24_v7, %v23_v6  ;;  %v25_v10 = vld [vmem:[%s310_s0 + $0x30] sm:$0xff]  ;;  %v26_v11 = vld [vmem:[%s310_s0 + $0x38] sm:$0xff] }
   0x4   :  { %209 = vmatprep.subr.bf16.mxu0 %v208_v3  ;;  %205 = vmatprep.mubr.msk.f32.mxu0 %vm28_vm0, %v17_v8  ;;  %v220_v12 = vpack.c.bf16 %v26_v11, %v25_v10  ;;  %v27_v13 = vld [vmem:[%s310_s0 + $0x40] sm:$0xff]  ;;  %v18_v14 = vld [vmem:[%s311_s1 + $0x8] sm:$0xff] }
   0x5   :  { %211 = vmatpush3.bf16.msra.mxu0 %v208_v3  ;;  %v128_v34 = vld [vmem:[%s312_s2] sm:$0xff]  ;;  %v129_v37 = vld [vmem:[%s312_s2 + $0x8] sm:$0xff] }
   0x6   :  { %213 = vmatprep.subr.bf16.mxu0 %v212_v5  ;;  %v136_v41 = vld [vmem:[%s313_s3] sm:$0xff]  ;;  %v137_v44 = vld [vmem:[%s313_s3 + $0x8] sm:$0xff] }
   0x9   :  { %215 = vmatpush3.bf16.msra.mxu0 %v212_v5 }
   0xa   :  { %217 = vmatprep.subr.bf16.mxu0 %v216_v9 }
   0xd   :  { %219 = vmatpush3.bf16.msra.mxu0 %v216_v9 }
   0xe   :  { %221 = vmatprep.subr.bf16.mxu0 %v220_v12 }
  0x11   :  { %223 = vmatpush3.bf16.msra.mxu0 %v220_v12 }
  0x12   :  { %203 = vmatprep.subr.mxu0 %v27_v13 }
  0x15   :  { %204 = vmatpush3.msra.mxu0 %v27_v13 }
  0x16   :  { %206 = vmatmul.mubr.msk.f32.vlgmr.msra.gmra.mrb[0].mxu0 %vm28_vm0, %v18_v14 }
  0xe9   :  { %v207_v15 = vpop.f32.mrb[0].mxu0 }
  0xea   :  { %v101_v16 = vpop.f32.mrb[1].mxu0  ;;  %v117_v18 = vmul.f32 %v207_v15, %v207_v15 }
  0xeb   :  { %110 = vadd.xlane.f32.xlu0 %v101_v16  ;;  %v116_v17 = vmul.f32 %v101_v16, %v101_v16 }
  0xed   :  { %118 = vadd.xlane.f32.xlu1 %v116_v17 }
  0xef   :  { %112 = vadd.xlane.f32.xlu0 %v207_v15 }
  0xf1   :  { %120 = vadd.xlane.f32.xlu1 %v117_v18 }
 0x178   :  { %v111_v20 = vpop.xlane.xlu0 %110 }
 0x179   :  { %v114_v21 = vmul.f32 0.0078125, %v111_v20 }
 0x17a   :  { %v119_v22 = vpop.xlane.xlu1 %118 }
 0x17b   :  { %v124_v23 = vmul.f32 %v114_v21, %v114_v21  ;;  %v122_v24 = vmul.f32 0.0078125, %v119_v22 }
 0x17c   :  { %v113_v25 = vpop.xlane.xlu0 %112 }
 0x17d   :  { %v126_v26 = vsub.f32 %v122_v24, %v124_v23  ;;  %v115_v27 = vmul.f32 0.0078125, %v113_v25 }
 0x17e   :  { %v121_v28 = vpop.xlane.xlu1 %120 }
 0x17f   :  { %v130_v29 = vadd.f32 1e-05, %v126_v26  ;;  %v125_v30 = vmul.f32 %v115_v27, %v115_v27  ;;  %v123_v31 = vmul.f32 0.0078125, %v121_v28 }
 0x181   :  { %227 = vrsqrt.f32 %v130_v29  ;;  %v127_v32 = vsub.f32 %v123_v31, %v125_v30 }
 0x183   :  { %v131_v33 = vadd.f32 1e-05, %v127_v32 }
 0x185   :  { %229 = vrsqrt.f32 %v131_v33 }
 0x18b   :  { %v228_v35 = vpop.eup %227 }
 0x18c   :  { %v134_v36 = vmul.f32 %v228_v35, %v128_v34 }
 0x18e   :  { %144 = vperm.xlu0 %225, %v134_v36   ;;  %v138_v40 = vmul.f32 %v134_v36, %v114_v21 }
 0x18f   :  { %v230_v38 = vpop.eup %229 }
 0x190   :  { %v135_v39 = vmul.f32 %v230_v38, %v129_v37  ;;  %v140_v42 = vsub.f32 %v136_v41, %v138_v40 }
 0x192   :  { %149 = vperm.xlu1 %226, %v135_v39   ;;  %v139_v43 = vmul.f32 %v135_v39, %v115_v27 }
 0x194   :  { %v141_v45 = vsub.f32 %v137_v44, %v139_v43 }
 0x196   :  { %156 = vperm.xlu1 %226, %v140_v42  }
 0x19a   :  { %161 = vperm.xlu1 %226, %v141_v45  }
 0x20d   :  { %v145_v46 = vpop.permute.xlu0 %144 }
 0x20e   :  { %v152_v48 = vmul.f32 %v145_v46, %v101_v16 }
 0x211   :  { %v150_v47 = vpop.permute.xlu1 %149 }
 0x212   :  { %v153_v51 = vmul.f32 %v207_v15, %v150_v47 }
 0x215   :  { %v157_v49 = vpop.permute.xlu1 %156 }
 0x216   :  { %v164_v50 = vadd.f32 %v157_v49, %v152_v48 }
 0x218   :  { %v166_v52 = vmax.f32 %v164_v50, 0.0 }
 0x219   :  { %v162_v53 = vpop.permute.xlu1 %161 }
 0x21a   :  { %168 = vst [vmem:[%s314_s4] sm:$0xff] %v166_v52  ;;  %v165_v54 = vadd.f32 %v162_v53, %v153_v51 }
 0x21c   :  { %v167_v55 = vmax.f32 %v165_v54, 0.0 }
 0x21e   :  { %169 = vst [vmem:[%s314_s4 + $0x8] sm:$0xff] %v167_v55 }

</bundles_post_ra>
